<compile_context>
chip_gen: v7x
topology: tpu7x:2x2x1
jax: 0.10.0
libtpu: 0.0.40
codegen_flags: <defaults>
</compile_context>

<pallas_src>
import functools

import jax
import jax.numpy as jnp
from jax.experimental import pallas as pl
from jax.experimental.pallas import tpu as pltpu

_SQRT_HALF = 0.7071067811865476
_EPS = 1e-5


def _erf(x):
    # erf via Abramowitz & Stegun 7.1.26 (|err| < 1.5e-7), built from
    # exp/abs/where + an EUP approximate reciprocal (co-issues with VPU/MXU).
    a1, a2, a3, a4, a5 = 0.254829592, -0.284496736, 1.421413741, -1.453152027, 1.061405429
    p = 0.3275911
    s = jnp.where(x >= 0.0, 1.0, -1.0)
    ax = jnp.abs(x)
    t = pl.reciprocal(1.0 + p * ax, approx=True)
    poly = ((((a5 * t + a4) * t + a3) * t + a2) * t + a1) * t
    return s * (1.0 - poly * jnp.exp(-ax * ax))


def _gelu(x):
    # nn.GELU() default = exact (erf-based) GELU.
    return 0.5 * x * (1.0 + _erf(x * _SQRT_HALF))


# ------------------------- Pallas kernels -------------------------

def _gcn_bn_gelu_kernel(x_ref, w_ref, abd_ref, b_ref, h_ref):
    """Fused GCN (1x1 conv + A contraction) + folded BN1 + exact GELU.

    x_ref:   (1, Cin, TtV)     input tile (bf16), lanes = fused (t, v)
    w_ref:   (K*Cout, Cin)     1x1-conv weight with BN1 scale folded in (bf16)
    abd_ref: (K, TtV, TtV)     per-frame block-diagonal adjacency (bf16)
    b_ref:   (Cout, TtV)       folded bias (conv bias through A + BN1 shift), f32
    h_ref:   (1, Cout, TtV)    output tile (bf16): GELU(BN1(gcn(x, A)))
    """
    K = abd_ref.shape[0]
    Cout = b_ref.shape[0]
    x = x_ref[0]                                   # (Cin, TtV) bf16
    acc = b_ref[...]                               # (Cout, TtV) f32
    if Cout % 8 == 0:
        # Hoisted: one (K*Cout, Cin) x (Cin, TtV) MXU matmul, then per-k
        # sublane-tile-aligned slices for the adjacency contraction.
        y = jnp.dot(w_ref[...], x, preferred_element_type=jnp.float32)
        for k in range(K):                         # K is small & static
            yk = y[k * Cout:(k + 1) * Cout].astype(x.dtype)
            acc = acc + jnp.dot(yk, abd_ref[k], preferred_element_type=jnp.float32)
    else:
        # Unaligned Cout: keep the original per-k form (no unaligned slices).
        for k in range(K):
            wk = w_ref[k * Cout:(k + 1) * Cout, :]
            yk = jnp.dot(wk, x, preferred_element_type=jnp.float32).astype(x.dtype)
            acc = acc + jnp.dot(yk, abd_ref[k], preferred_element_type=jnp.float32)
    h_ref[0] = _gelu(acc).astype(h_ref.dtype)


def _tcn_res_gelu_kernel(h_ref, halo_ref, xres_ref, wt_ref, b2_ref, o_ref, *, V):
    """Fused temporal conv (kt x 1) + folded BN2 + identity residual + GELU.

    h_ref:    (1, C, TtV)       GCN output tile (post BN1+GELU), bf16
    halo_ref: (1, 1, C, 2*p*V)  [prev p frames | next p frames] of the tile, bf16
                                (zero-filled at the sequence boundaries)
    xres_ref: (1, C, TtV)       identity residual (the block input x), bf16
    wt_ref:   (kt, C, C)        temporal conv weights with BN2 scale folded in, bf16
    b2_ref:   (C, 1)            folded conv-bias + BN2 shift, f32
    o_ref:    (1, C, TtV)       block output, f32
    """
    TV = h_ref.shape[2]
    kt = wt_ref.shape[0]
    pad = (kt - 1) // 2
    h = h_ref[0]                                   # (C, TtV) bf16
    if pad > 0:
        pv = pad * V
        halo = halo_ref[0, 0]                      # (C, 2*pv) bf16
        hcat = jnp.concatenate([halo[:, :pv], h, halo[:, pv:]], axis=1)
    else:
        hcat = h
    acc = xres_ref[0].astype(jnp.float32) + b2_ref[...]
    for dt in range(kt):                           # kt is small & static
        # output frame tl reads hcat frame tl + dt  (== tl + (dt - pad) + pad)
        s = hcat[:, dt * V:dt * V + TV]
        acc = acc + jnp.dot(wt_ref[dt], s, preferred_element_type=jnp.float32)
    o_ref[0] = _gelu(acc)


# ------------------------- tiling helpers -------------------------

def _pick_t_tile(T, Vp, target_lanes):
    """Largest divisor Tt of T with (Tt*Vp) % 128 == 0 and Tt*Vp <= target_lanes,
    else the smallest aligned divisor; None if no aligned divisor exists."""
    best = None
    for tt in range(1, T + 1):
        if T % tt or (tt * Vp) % 128:
            continue
        if tt * Vp <= target_lanes:
            best = tt
        else:
            if best is None:
                best = tt
            break
    return best


def _choose_vertex_pad(T, V):
    """Smallest Vp >= V for which some T-tile is 128-lane aligned."""
    for vp in range(V, V + 129):
        if _pick_t_tile(T, vp, 1 << 30) is not None:
            return vp
    return V + (-V) % 128  # unreachable (vp multiple of 128 always aligns)


def _build_halo(h4, Tt2, pad, dtype):
    """(N, nT2, C, 2*pad*Vp): per tile [prev pad frames | next pad frames],
    zero-filled at the sequence boundaries (== the conv's temporal zero padding)."""
    N, C, T, Vp = h4.shape
    nT2 = T // Tt2
    if pad == 0:
        return jnp.zeros((N, nT2, C, Vp), dtype)   # dummy, unused by the kernel
    z = jnp.zeros((N, C, pad, Vp), h4.dtype)
    tiles = []
    for t in range(nT2):                           # nT2 is small & static
        s = t * Tt2
        prev = z if t == 0 else h4[:, :, s - pad:s, :]
        nxt = z if t == nT2 - 1 else h4[:, :, s + Tt2:s + Tt2 + pad, :]
        tiles.append(jnp.concatenate([prev, nxt], axis=2))     # (N, C, 2*pad, Vp)
    halo = jnp.stack(tiles, axis=1)                             # (N, nT2, C, 2*pad, Vp)
    return halo.reshape(N, nT2, C, 2 * pad * Vp).astype(dtype)


# ------------------------- wrapper -------------------------

def rfid_st_forward(x, A, p, eps=_EPS, target_lanes_gcn=256, target_lanes_tcn=1024):
    # NOTE: target_lanes_gcn=256 suits the 256-wide MXU parts (v6e/v7x);
    # on v5e (128-wide MXU) target_lanes_gcn=128 further trims block-diag waste.
    N, Cin, T, V = x.shape
    K = A.shape[0]
    KC = p["gcn_w"].shape[0]
    Cout = KC // K
    kt = p["tcn_w"].shape[2]
    pad = (kt - 1) // 2
    assert Cin == Cout, "only the identity-residual configuration is implemented"

    f32, bf16 = jnp.float32, jnp.bfloat16

    Vp = _choose_vertex_pad(T, V)
    Tt1 = _pick_t_tile(T, Vp, target_lanes_gcn)
    Tt2 = _pick_t_tile(T, Vp, target_lanes_tcn)
    assert Tt1 is not None and Tt2 is not None
    if Tt2 < pad:                 # halo must come from the directly adjacent tile
        Tt2 = T
    nT1, nT2 = T // Tt1, T // Tt2
    TVp = T * Vp

    if Vp != V:                   # zero-pad vertices (padded lanes are discarded)
        x = jnp.pad(x, ((0, 0), (0, 0), (0, 0), (0, Vp - V)))
        A = jnp.pad(A, ((0, 0), (0, Vp - V), (0, Vp - V)))
    A = A.astype(f32)

    # ---- fold BN1 (inference) into the GCN weights / bias ----
    s1 = p["bn1_gamma"] * jax.lax.rsqrt(p["bn1_var"] + eps)
    h1 = p["bn1_beta"] - p["bn1_mean"] * s1
    wg = p["gcn_w"].reshape(K, Cout, Cin) * s1[None, :, None]
    wg_flat = wg.reshape(K * Cout, Cin).astype(bf16)
    bg = p["gcn_b"].reshape(K, Cout)
    asum = jnp.sum(A, axis=1)                                           # (K, Vp)
    bias1 = s1[:, None] * jnp.einsum("kc,kw->cw", bg, asum) + h1[:, None]
    bias1_t = jnp.tile(bias1, (1, Tt1)).astype(f32)                     # (Cout, Tt1*Vp)

    # Per-frame block-diagonal adjacency: abd[k, t*Vp+v, s*Vp+w] = (t==s) * A[k, v, w].
    abd = jnp.einsum("ts,kvw->ktvsw", jnp.eye(Tt1, dtype=f32), A)
    abd = abd.reshape(K, Tt1 * Vp, Tt1 * Vp).astype(bf16)

    x3 = x.reshape(N, Cin, TVp).astype(bf16)       # fuse (T, Vp) into a lane-dense axis

    gcn_out = pl.pallas_call(
        _gcn_bn_gelu_kernel,
        out_shape=jax.ShapeDtypeStruct((N, Cout, TVp), bf16),
        grid=(N, nT1),
        in_specs=[
            pl.BlockSpec((1, Cin, Tt1 * Vp), lambda n, t: (n, 0, t)),
            pl.BlockSpec((K * Cout, Cin), lambda n, t: (0, 0)),
            pl.BlockSpec((K, Tt1 * Vp, Tt1 * Vp), lambda n, t: (0, 0, 0)),
            pl.BlockSpec((Cout, Tt1 * Vp), lambda n, t: (0, 0)),
        ],
        out_specs=pl.BlockSpec((1, Cout, Tt1 * Vp), lambda n, t: (n, 0, t)),
        compiler_params=pltpu.CompilerParams(
            dimension_semantics=("parallel", "parallel"),
            vmem_limit_bytes=32 * 1024 * 1024),
    )(x3, wg_flat, abd, bias1_t)

    # ---- fold conv bias + BN2 (inference) into the temporal conv weights / bias ----
    s2 = p["bn2_gamma"] * jax.lax.rsqrt(p["bn2_var"] + eps)
    h2 = p["bn2_beta"] - p["bn2_mean"] * s2
    wt = (jnp.transpose(p["tcn_w"][..., 0], (2, 0, 1)) * s2[None, :, None]).astype(bf16)
    b2 = ((s2 * p["tcn_b"] + h2)[:, None]).astype(f32)                  # (Cout, 1)

    # Tiny per-tile halo (prev/next (kt-1)//2 frames, zero at sequence ends).
    halo = _build_halo(gcn_out.reshape(N, Cout, T, Vp), Tt2, pad, bf16)
    hw = halo.shape[-1]

    out = pl.pallas_call(
        functools.partial(_tcn_res_gelu_kernel, V=Vp),
        out_shape=jax.ShapeDtypeStruct((N, Cout, TVp), f32),
        grid=(N, nT2),
        in_specs=[
            pl.BlockSpec((1, Cout, Tt2 * Vp), lambda n, t: (n, 0, t)),
            pl.BlockSpec((1, 1, Cout, hw), lambda n, t: (n, t, 0, 0)),
            pl.BlockSpec((1, Cin, Tt2 * Vp), lambda n, t: (n, 0, t)),
            pl.BlockSpec((kt, Cout, Cout), lambda n, t: (0, 0, 0)),
            pl.BlockSpec((Cout, 1), lambda n, t: (0, 0)),
        ],
        out_specs=pl.BlockSpec((1, Cout, Tt2 * Vp), lambda n, t: (n, 0, t)),
        compiler_params=pltpu.CompilerParams(
            dimension_semantics=("parallel", "parallel"),
            vmem_limit_bytes=32 * 1024 * 1024),
    )(gcn_out, halo, x3, wt, b2)

    out = out.reshape(N, Cout, T, Vp)
    if Vp != V:
        out = out[..., :V]
    return out


# ------------------------- pure-JAX reference (for validation) -------------------------

def rfid_st_reference(x, A, p, eps=_EPS):
    N, Cin, T, V = x.shape
    K = A.shape[0]
    KC = p["gcn_w"].shape[0]
    Cout = KC // K
    kt = p["tcn_w"].shape[2]
    pad = (kt - 1) // 2

    w = p["gcn_w"].reshape(KC, Cin)
    y = jnp.einsum("oc,nctv->notv", w, x, precision="highest") + p["gcn_b"][None, :, None, None]
    y = y.reshape(N, K, Cout, T, V)
    g = jnp.einsum("nkctv,kvw->nctw", y, A, precision="highest")

    def bn(z, gamma, beta, mean, var):
        sc = gamma * jax.lax.rsqrt(var + eps)
        return z * sc[None, :, None, None] + (beta - mean * sc)[None, :, None, None]

    h = jax.nn.gelu(bn(g, p["bn1_gamma"], p["bn1_beta"], p["bn1_mean"], p["bn1_var"]),
                    approximate=False)
    hp = jnp.pad(h, ((0, 0), (0, 0), (pad, pad), (0, 0)))
    wt = p["tcn_w"][..., 0]                               # (Cout, Cout, kt)
    conv = jnp.zeros((N, Cout, T, V), jnp.float32)
    for dt in range(kt):
        conv = conv + jnp.einsum("oi,nitv->notv", wt[:, :, dt], hp[:, :, dt:dt + T, :],
                                 precision="highest")
    conv = conv + p["tcn_b"][None, :, None, None]
    z = bn(conv, p["bn2_gamma"], p["bn2_beta"], p["bn2_mean"], p["bn2_var"]) + x
    return jax.nn.gelu(z, approximate=False)


# ------------------------- deterministic parameter init -------------------------

def init_params(key, c_in, c_out, spatial_k, temporal_k):
    ks = jax.random.split(key, 12)
    f32 = jnp.float32
    return {
        # GraphConvolution.conv : Conv2d(c_in, c_out*K, (1,1))
        "gcn_w": 0.2 * jax.random.normal(ks[0], (c_out * spatial_k, c_in, 1, 1), f32),
        "gcn_b": 0.1 * jax.random.normal(ks[1], (c_out * spatial_k,), f32),
        # rfid_tcn[0] : BatchNorm2d(c_out)   (inference-mode running stats)
        "bn1_gamma": 1.0 + 0.1 * jax.random.normal(ks[2], (c_out,), f32),
        "bn1_beta": 0.1 * jax.random.normal(ks[3], (c_out,), f32),
        "bn1_mean": 0.1 * jax.random.normal(ks[4], (c_out,), f32),
        "bn1_var": jax.random.uniform(ks[5], (c_out,), f32, 0.5, 1.5),
        # rfid_tcn[2] : Conv2d(c_out, c_out, (kt,1), stride (1,1), pad ((kt-1)//2,0))
        "tcn_w": 0.2 * jax.random.normal(ks[6], (c_out, c_out, temporal_k, 1), f32),
        "tcn_b": 0.1 * jax.random.normal(ks[7], (c_out,), f32),
        # rfid_tcn[3] : BatchNorm2d(c_out)
        "bn2_gamma": 1.0 + 0.1 * jax.random.normal(ks[8], (c_out,), f32),
        "bn2_beta": 0.1 * jax.random.normal(ks[9], (c_out,), f32),
        "bn2_mean": 0.1 * jax.random.normal(ks[10], (c_out,), f32),
        "bn2_var": jax.random.uniform(ks[11], (c_out,), f32, 0.5, 1.5),
    }


if __name__ == "__main__":
    def run_case(case_key, N, C, T, V, kt, K_spatial, tol=6e-2):
        k_x, k_a, k_p = jax.random.split(case_key, 3)
        x = jax.random.normal(k_x, (N, C, T, V), dtype=jnp.float32)
        A = jax.random.uniform(k_a, (K_spatial, V, V), dtype=jnp.float32) / V
        params = init_params(k_p, C, C, K_spatial, kt)

        fwd = jax.jit(rfid_st_forward)
        out = jax.block_until_ready(fwd(x, A, params))
        ref = rfid_st_reference(x, A, params)

        assert out.shape == (N, C, T, V)
        assert bool(jnp.all(jnp.isfinite(out)))
        err = float(jnp.max(jnp.abs(out - ref)))
        # Tolerance accounts for bf16 matmul operands (accumulation stays f32).
        assert err < tol, f"max abs error {err}"

    key = jax.random.PRNGKey(0)
    k1, k2, k3 = jax.random.split(key, 3)
    # Primary config (matches kernel_size=(3, 3) of the PyTorch module).
    run_case(k1, N=2, C=4, T=16, V=16, kt=3, K_spatial=3)
    # Multiple T tiles in both kernels, kt=5 halo, hoisted-matmul (C%8==0) path.
    run_case(k2, N=2, C=8, T=160, V=16, kt=5, K_spatial=3)
    # V=25 (skeleton-style) exercises the vertex-padding path (Vp=32).
    run_case(k3, N=1, C=8, T=12, V=25, kt=3, K_spatial=3)
    print("KERNEL_OK")
</pallas_src>

<mosaic_0001>
module attributes {stable_mosaic.version = 11 : i64} {
  func.func @_gcn_bn_gelu_kernel(%arg0: i32, %arg1: i32, %arg2: memref<1x4x256xbf16, #tpu.memory_space<vmem>>, %arg3: memref<12x4xbf16, #tpu.memory_space<vmem>>, %arg4: memref<3x256x256xbf16, #tpu.memory_space<vmem>>, %arg5: memref<4x256xf32, #tpu.memory_space<vmem>>, %arg6: memref<1x4x256xbf16, #tpu.memory_space<vmem>>) attributes {dimension_semantics = [#tpu.dimension_semantics<parallel>, #tpu.dimension_semantics<parallel>], iteration_bounds = array<i64: 2, 1>, scalar_prefetch = 0 : i64, scratch_operands = 0 : i64, tpu.core_type = #tpu.core_type<tc>, window_params = [{transform_indices = @transform_0, window_bounds = array<i64: 1, 4, 256>}, {pipeline_mode = #tpu.pipeline_mode<synchronous>, transform_indices = @transform_1, window_bounds = array<i64: 12, 4>}, {pipeline_mode = #tpu.pipeline_mode<synchronous>, transform_indices = @transform_2, window_bounds = array<i64: 3, 256, 256>}, {pipeline_mode = #tpu.pipeline_mode<synchronous>, transform_indices = @transform_3, window_bounds = array<i64: 4, 256>}, {transform_indices = @transform_4, window_bounds = array<i64: 1, 4, 256>}]} {
    %c0 = arith.constant 0 : index
    %c0_0 = arith.constant 0 : index
    %c0_1 = arith.constant 0 : index
    %0 = vector.load %arg2[%c0, %c0_0, %c0_1] : memref<1x4x256xbf16, #tpu.memory_space<vmem>>, vector<1x4x256xbf16>
    %1 = vector.shape_cast %0 : vector<1x4x256xbf16> to vector<4x256xbf16>
    %c0_2 = arith.constant 0 : index
    %c0_3 = arith.constant 0 : index
    %2 = vector.load %arg5[%c0_2, %c0_3] : memref<4x256xf32, #tpu.memory_space<vmem>>, vector<4x256xf32>
    %c0_4 = arith.constant 0 : index
    %c0_5 = arith.constant 0 : index
    %3 = vector.load %arg3[%c0_4, %c0_5] : memref<12x4xbf16, #tpu.memory_space<vmem>>, vector<4x4xbf16>
    %cst = arith.constant dense<0.000000e+00> : vector<4x256xf32>
    %4 = tpu.matmul %3, %1, %cst {dimension_numbers = #tpu.dot_dimension_numbers<[1], [0], [0], [1], [0, 0, 1, 1], [], []>} : vector<4x4xbf16>, vector<4x256xbf16>, vector<4x256xf32> -> vector<4x256xf32>
    %5 = arith.truncf %4 : vector<4x256xf32> to vector<4x256xbf16>
    %c0_6 = arith.constant 0 : index
    %c0_7 = arith.constant 0 : index
    %c0_8 = arith.constant 0 : index
    %6 = vector.load %arg4[%c0_6, %c0_7, %c0_8] : memref<3x256x256xbf16, #tpu.memory_space<vmem>>, vector<1x256x256xbf16>
    %7 = vector.shape_cast %6 : vector<1x256x256xbf16> to vector<256x256xbf16>
    %cst_9 = arith.constant dense<0.000000e+00> : vector<4x256xf32>
    %8 = tpu.matmul %5, %7, %cst_9 {dimension_numbers = #tpu.dot_dimension_numbers<[1], [0], [0], [1], [0, 0, 1, 1], [], []>} : vector<4x256xbf16>, vector<256x256xbf16>, vector<4x256xf32> -> vector<4x256xf32>
    %9 = arith.addf %2, %8 : vector<4x256xf32>
    %c4 = arith.constant 4 : index
    %c0_10 = arith.constant 0 : index
    %10 = vector.load %arg3[%c4, %c0_10] : memref<12x4xbf16, #tpu.memory_space<vmem>>, vector<4x4xbf16>
    %cst_11 = arith.constant dense<0.000000e+00> : vector<4x256xf32>
    %11 = tpu.matmul %10, %1, %cst_11 {dimension_numbers = #tpu.dot_dimension_numbers<[1], [0], [0], [1], [0, 0, 1, 1], [], []>} : vector<4x4xbf16>, vector<4x256xbf16>, vector<4x256xf32> -> vector<4x256xf32>
    %12 = arith.truncf %11 : vector<4x256xf32> to vector<4x256xbf16>
    %c1 = arith.constant 1 : index
    %c0_12 = arith.constant 0 : index
    %c0_13 = arith.constant 0 : index
    %13 = vector.load %arg4[%c1, %c0_12, %c0_13] : memref<3x256x256xbf16, #tpu.memory_space<vmem>>, vector<1x256x256xbf16>
    %14 = vector.shape_cast %13 : vector<1x256x256xbf16> to vector<256x256xbf16>
    %cst_14 = arith.constant dense<0.000000e+00> : vector<4x256xf32>
    %15 = tpu.matmul %12, %14, %cst_14 {dimension_numbers = #tpu.dot_dimension_numbers<[1], [0], [0], [1], [0, 0, 1, 1], [], []>} : vector<4x256xbf16>, vector<256x256xbf16>, vector<4x256xf32> -> vector<4x256xf32>
    %16 = arith.addf %9, %15 : vector<4x256xf32>
    %c8 = arith.constant 8 : index
    %c0_15 = arith.constant 0 : index
    %17 = vector.load %arg3[%c8, %c0_15] : memref<12x4xbf16, #tpu.memory_space<vmem>>, vector<4x4xbf16>
    %cst_16 = arith.constant dense<0.000000e+00> : vector<4x256xf32>
    %18 = tpu.matmul %17, %1, %cst_16 {dimension_numbers = #tpu.dot_dimension_numbers<[1], [0], [0], [1], [0, 0, 1, 1], [], []>} : vector<4x4xbf16>, vector<4x256xbf16>, vector<4x256xf32> -> vector<4x256xf32>
    %19 = arith.truncf %18 : vector<4x256xf32> to vector<4x256xbf16>
    %c2 = arith.constant 2 : index
    %c0_17 = arith.constant 0 : index
    %c0_18 = arith.constant 0 : index
    %20 = vector.load %arg4[%c2, %c0_17, %c0_18] : memref<3x256x256xbf16, #tpu.memory_space<vmem>>, vector<1x256x256xbf16>
    %21 = vector.shape_cast %20 : vector<1x256x256xbf16> to vector<256x256xbf16>
    %cst_19 = arith.constant dense<0.000000e+00> : vector<4x256xf32>
    %22 = tpu.matmul %19, %21, %cst_19 {dimension_numbers = #tpu.dot_dimension_numbers<[1], [0], [0], [1], [0, 0, 1, 1], [], []>} : vector<4x256xbf16>, vector<256x256xbf16>, vector<4x256xf32> -> vector<4x256xf32>
    %23 = arith.addf %16, %22 : vector<4x256xf32>
    %cst_20 = arith.constant 5.000000e-01 : f32
    %24 = vector.broadcast %cst_20 : f32 to vector<4x256xf32>
    %25 = arith.mulf %24, %23 : vector<4x256xf32>
    %cst_21 = arith.constant 0.707106769 : f32
    %26 = vector.broadcast %cst_21 : f32 to vector<4x256xf32>
    %27 = arith.mulf %23, %26 : vector<4x256xf32>
    %cst_22 = arith.constant 0.000000e+00 : f32
    %28 = vector.broadcast %cst_22 : f32 to vector<4x256xf32>
    %29 = arith.cmpf oge, %27, %28 : vector<4x256xf32>
    %cst_23 = arith.constant 1.000000e+00 : f32
    %cst_24 = arith.constant -1.000000e+00 : f32
    %30 = vector.broadcast %cst_23 : f32 to vector<4x256xf32>
    %31 = vector.broadcast %cst_24 : f32 to vector<4x256xf32>
    %32 = arith.select %29, %30, %31 : vector<4x256xi1>, vector<4x256xf32>
    %33 = math.absf %27 : vector<4x256xf32>
    %cst_25 = arith.constant 0.327591091 : f32
    %34 = vector.broadcast %cst_25 : f32 to vector<4x256xf32>
    %35 = arith.mulf %34, %33 : vector<4x256xf32>
    %cst_26 = arith.constant 1.000000e+00 : f32
    %36 = vector.broadcast %cst_26 : f32 to vector<4x256xf32>
    %37 = arith.addf %36, %35 : vector<4x256xf32>
    %38 = tpu.reciprocal %37 {approx = true} : vector<4x256xf32> -> vector<4x256xf32>
    %cst_27 = arith.constant 1.06140542 : f32
    %39 = vector.broadcast %cst_27 : f32 to vector<4x256xf32>
    %40 = arith.mulf %39, %38 : vector<4x256xf32>
    %cst_28 = arith.constant -1.45315206 : f32
    %41 = vector.broadcast %cst_28 : f32 to vector<4x256xf32>
    %42 = arith.addf %40, %41 : vector<4x256xf32>
    %43 = arith.mulf %42, %38 : vector<4x256xf32>
    %cst_29 = arith.constant 1.42141378 : f32
    %44 = vector.broadcast %cst_29 : f32 to vector<4x256xf32>
    %45 = arith.addf %43, %44 : vector<4x256xf32>
    %46 = arith.mulf %45, %38 : vector<4x256xf32>
    %cst_30 = arith.constant -0.284496725 : f32
    %47 = vector.broadcast %cst_30 : f32 to vector<4x256xf32>
    %48 = arith.addf %46, %47 : vector<4x256xf32>
    %49 = arith.mulf %48, %38 : vector<4x256xf32>
    %cst_31 = arith.constant 0.254829586 : f32
    %50 = vector.broadcast %cst_31 : f32 to vector<4x256xf32>
    %51 = arith.addf %49, %50 : vector<4x256xf32>
    %52 = arith.mulf %51, %38 : vector<4x256xf32>
    %cst_32 = arith.constant 0.000000e+00 : f32
    %53 = vector.broadcast %cst_32 : f32 to vector<4x256xf32>
    %54 = arith.subf %53, %33 : vector<4x256xf32>
    %55 = arith.mulf %54, %33 : vector<4x256xf32>
    %56 = math.exp %55 : vector<4x256xf32>
    %57 = arith.mulf %52, %56 : vector<4x256xf32>
    %cst_33 = arith.constant 1.000000e+00 : f32
    %58 = vector.broadcast %cst_33 : f32 to vector<4x256xf32>
    %59 = arith.subf %58, %57 : vector<4x256xf32>
    %60 = arith.mulf %32, %59 : vector<4x256xf32>
    %cst_34 = arith.constant 1.000000e+00 : f32
    %61 = vector.broadcast %cst_34 : f32 to vector<4x256xf32>
    %62 = arith.addf %61, %60 : vector<4x256xf32>
    %63 = arith.mulf %25, %62 : vector<4x256xf32>
    %64 = arith.truncf %63 : vector<4x256xf32> to vector<4x256xbf16>
    %c0_35 = arith.constant 0 : index
    %c0_36 = arith.constant 0 : index
    %c0_37 = arith.constant 0 : index
    %65 = vector.load %arg6[%c0_35, %c0_36, %c0_37] : memref<1x4x256xbf16, #tpu.memory_space<vmem>>, vector<1x4x256xbf16>
    %66 = vector.shape_cast %65 : vector<1x4x256xbf16> to vector<4x256xbf16>
    %67 = vector.shape_cast %64 : vector<4x256xbf16> to vector<1x4x256xbf16>
    tpu.vector_store %arg6[%c0_35, %c0_36, %c0_37], %67 {strides = array<i32>} : memref<1x4x256xbf16, #tpu.memory_space<vmem>>, vector<1x4x256xbf16>,
    return
  }
  func.func @transform_0(%arg0: i32, %arg1: i32) -> (i32, i32, i32) {
    %c0_i32 = arith.constant 0 : i32
    %c0_i32_0 = arith.constant 0 : i32
    return %arg0, %c0_i32, %arg1 : i32, i32, i32
  }
  func.func @transform_1(%arg0: i32, %arg1: i32) -> (i32, i32) {
    %c0_i32 = arith.constant 0 : i32
    %c0_i32_0 = arith.constant 0 : i32
    %c0_i32_1 = arith.constant 0 : i32
    return %c0_i32, %c0_i32_0 : i32, i32
  }
  func.func @transform_2(%arg0: i32, %arg1: i32) -> (i32, i32, i32) {
    %c0_i32 = arith.constant 0 : i32
    %c0_i32_0 = arith.constant 0 : i32
    %c0_i32_1 = arith.constant 0 : i32
    %c0_i32_2 = arith.constant 0 : i32
    return %c0_i32, %c0_i32_0, %c0_i32_1 : i32, i32, i32
  }
  func.func @transform_3(%arg0: i32, %arg1: i32) -> (i32, i32) {
    %c0_i32 = arith.constant 0 : i32
    %c0_i32_0 = arith.constant 0 : i32
    %c0_i32_1 = arith.constant 0 : i32
    return %c0_i32, %c0_i32_0 : i32, i32
  }
  func.func @transform_4(%arg0: i32, %arg1: i32) -> (i32, i32, i32) {
    %c0_i32 = arith.constant 0 : i32
    %c0_i32_0 = arith.constant 0 : i32
    return %arg0, %c0_i32, %arg1 : i32, i32, i32
  }
}

module attributes {stable_mosaic.version = 11 : i64} {
  func.func @_tcn_res_gelu_kernel(%arg0: i32, %arg1: i32, %arg2: memref<1x4x256xbf16, #tpu.memory_space<vmem>>, %arg3: memref<1x1x4x32xbf16, #tpu.memory_space<vmem>>, %arg4: memref<1x4x256xbf16, #tpu.memory_space<vmem>>, %arg5: memref<3x4x4xbf16, #tpu.memory_space<vmem>>, %arg6: memref<4x1xf32, #tpu.memory_space<vmem>>, %arg7: memref<1x4x256xf32, #tpu.memory_space<vmem>>) attributes {dimension_semantics = [#tpu.dimension_semantics<parallel>, #tpu.dimension_semantics<parallel>], iteration_bounds = array<i64: 2, 1>, scalar_prefetch = 0 : i64, scratch_operands = 0 : i64, tpu.core_type = #tpu.core_type<tc>, window_params = [{transform_indices = @transform_0, window_bounds = array<i64: 1, 4, 256>}, {transform_indices = @transform_1, window_bounds = array<i64: 1, 1, 4, 32>}, {transform_indices = @transform_2, window_bounds = array<i64: 1, 4, 256>}, {pipeline_mode = #tpu.pipeline_mode<synchronous>, transform_indices = @transform_3, window_bounds = array<i64: 3, 4, 4>}, {pipeline_mode = #tpu.pipeline_mode<synchronous>, transform_indices = @transform_4, window_bounds = array<i64: 4, 1>}, {transform_indices = @transform_5, window_bounds = array<i64: 1, 4, 256>}]} {
    %c0 = arith.constant 0 : index
    %c0_0 = arith.constant 0 : index
    %c0_1 = arith.constant 0 : index
    %0 = vector.load %arg2[%c0, %c0_0, %c0_1] : memref<1x4x256xbf16, #tpu.memory_space<vmem>>, vector<1x4x256xbf16>
    %1 = vector.shape_cast %0 : vector<1x4x256xbf16> to vector<4x256xbf16>
    %c0_2 = arith.constant 0 : index
    %c0_3 = arith.constant 0 : index
    %c0_4 = arith.constant 0 : index
    %c0_5 = arith.constant 0 : index
    %2 = vector.load %arg3[%c0_2, %c0_3, %c0_4, %c0_5] : memref<1x1x4x32xbf16, #tpu.memory_space<vmem>>, vector<1x1x4x32xbf16>
    %3 = vector.shape_cast %2 : vector<1x1x4x32xbf16> to vector<4x32xbf16>
    %4 = vector.extract_strided_slice %3 {offsets = [0, 0], sizes = [4, 16], strides = [1, 1]} : vector<4x32xbf16> to vector<4x16xbf16>
    %5 = vector.extract_strided_slice %3 {offsets = [0, 16], sizes = [4, 16], strides = [1, 1]} : vector<4x32xbf16> to vector<4x16xbf16>
    %6 = tpu.concatenate %4, %1, %5 in 1 : vector<4x16xbf16>, vector<4x256xbf16>, vector<4x16xbf16> -> vector<4x288xbf16>
    %c0_6 = arith.constant 0 : index
    %c0_7 = arith.constant 0 : index
    %c0_8 = arith.constant 0 : index
    %7 = vector.load %arg4[%c0_6, %c0_7, %c0_8] : memref<1x4x256xbf16, #tpu.memory_space<vmem>>, vector<1x4x256xbf16>
    %8 = vector.shape_cast %7 : vector<1x4x256xbf16> to vector<4x256xbf16>
    %9 = arith.extf %8 : vector<4x256xbf16> to vector<4x256xf32>
    %c0_9 = arith.constant 0 : index
    %c0_10 = arith.constant 0 : index
    %10 = vector.load %arg6[%c0_9, %c0_10] : memref<4x1xf32, #tpu.memory_space<vmem>>, vector<4x1xf32>
    %11 = vector.broadcast %10 : vector<4x1xf32> to vector<4x256xf32>
    %12 = arith.addf %9, %11 : vector<4x256xf32>
    %13 = vector.extract_strided_slice %6 {offsets = [0, 0], sizes = [4, 256], strides = [1, 1]} : vector<4x288xbf16> to vector<4x256xbf16>
    %c0_11 = arith.constant 0 : index
    %c0_12 = arith.constant 0 : index
    %c0_13 = arith.constant 0 : index
    %14 = vector.load %arg5[%c0_11, %c0_12, %c0_13] : memref<3x4x4xbf16, #tpu.memory_space<vmem>>, vector<1x4x4xbf16>
    %15 = vector.shape_cast %14 : vector<1x4x4xbf16> to vector<4x4xbf16>
    %cst = arith.constant dense<0.000000e+00> : vector<4x256xf32>
    %16 = tpu.matmul %15, %13, %cst {dimension_numbers = #tpu.dot_dimension_numbers<[1], [0], [0], [1], [0, 0, 1, 1], [], []>} : vector<4x4xbf16>, vector<4x256xbf16>, vector<4x256xf32> -> vector<4x256xf32>
    %17 = arith.addf %12, %16 : vector<4x256xf32>
    %18 = vector.extract_strided_slice %6 {offsets = [0, 16], sizes = [4, 256], strides = [1, 1]} : vector<4x288xbf16> to vector<4x256xbf16>
    %c1 = arith.constant 1 : index
    %c0_14 = arith.constant 0 : index
    %c0_15 = arith.constant 0 : index
    %19 = vector.load %arg5[%c1, %c0_14, %c0_15] : memref<3x4x4xbf16, #tpu.memory_space<vmem>>, vector<1x4x4xbf16>
    %20 = vector.shape_cast %19 : vector<1x4x4xbf16> to vector<4x4xbf16>
    %cst_16 = arith.constant dense<0.000000e+00> : vector<4x256xf32>
    %21 = tpu.matmul %20, %18, %cst_16 {dimension_numbers = #tpu.dot_dimension_numbers<[1], [0], [0], [1], [0, 0, 1, 1], [], []>} : vector<4x4xbf16>, vector<4x256xbf16>, vector<4x256xf32> -> vector<4x256xf32>
    %22 = arith.addf %17, %21 : vector<4x256xf32>
    %23 = vector.extract_strided_slice %6 {offsets = [0, 32], sizes = [4, 256], strides = [1, 1]} : vector<4x288xbf16> to vector<4x256xbf16>
    %c2 = arith.constant 2 : index
    %c0_17 = arith.constant 0 : index
    %c0_18 = arith.constant 0 : index
    %24 = vector.load %arg5[%c2, %c0_17, %c0_18] : memref<3x4x4xbf16, #tpu.memory_space<vmem>>, vector<1x4x4xbf16>
    %25 = vector.shape_cast %24 : vector<1x4x4xbf16> to vector<4x4xbf16>
    %cst_19 = arith.constant dense<0.000000e+00> : vector<4x256xf32>
    %26 = tpu.matmul %25, %23, %cst_19 {dimension_numbers = #tpu.dot_dimension_numbers<[1], [0], [0], [1], [0, 0, 1, 1], [], []>} : vector<4x4xbf16>, vector<4x256xbf16>, vector<4x256xf32> -> vector<4x256xf32>
    %27 = arith.addf %22, %26 : vector<4x256xf32>
    %cst_20 = arith.constant 5.000000e-01 : f32
    %28 = vector.broadcast %cst_20 : f32 to vector<4x256xf32>
    %29 = arith.mulf %28, %27 : vector<4x256xf32>
    %cst_21 = arith.constant 0.707106769 : f32
    %30 = vector.broadcast %cst_21 : f32 to vector<4x256xf32>
    %31 = arith.mulf %27, %30 : vector<4x256xf32>
    %cst_22 = arith.constant 0.000000e+00 : f32
    %32 = vector.broadcast %cst_22 : f32 to vector<4x256xf32>
    %33 = arith.cmpf oge, %31, %32 : vector<4x256xf32>
    %cst_23 = arith.constant 1.000000e+00 : f32
    %cst_24 = arith.constant -1.000000e+00 : f32
    %34 = vector.broadcast %cst_23 : f32 to vector<4x256xf32>
    %35 = vector.broadcast %cst_24 : f32 to vector<4x256xf32>
    %36 = arith.select %33, %34, %35 : vector<4x256xi1>, vector<4x256xf32>
    %37 = math.absf %31 : vector<4x256xf32>
    %cst_25 = arith.constant 0.327591091 : f32
    %38 = vector.broadcast %cst_25 : f32 to vector<4x256xf32>
    %39 = arith.mulf %38, %37 : vector<4x256xf32>
    %cst_26 = arith.constant 1.000000e+00 : f32
    %40 = vector.broadcast %cst_26 : f32 to vector<4x256xf32>
    %41 = arith.addf %40, %39 : vector<4x256xf32>
    %42 = tpu.reciprocal %41 {approx = true} : vector<4x256xf32> -> vector<4x256xf32>
    %cst_27 = arith.constant 1.06140542 : f32
    %43 = vector.broadcast %cst_27 : f32 to vector<4x256xf32>
    %44 = arith.mulf %43, %42 : vector<4x256xf32>
    %cst_28 = arith.constant -1.45315206 : f32
    %45 = vector.broadcast %cst_28 : f32 to vector<4x256xf32>
    %46 = arith.addf %44, %45 : vector<4x256xf32>
    %47 = arith.mulf %46, %42 : vector<4x256xf32>
    %cst_29 = arith.constant 1.42141378 : f32
    %48 = vector.broadcast %cst_29 : f32 to vector<4x256xf32>
    %49 = arith.addf %47, %48 : vector<4x256xf32>
    %50 = arith.mulf %49, %42 : vector<4x256xf32>
    %cst_30 = arith.constant -0.284496725 : f32
    %51 = vector.broadcast %cst_30 : f32 to vector<4x256xf32>
    %52 = arith.addf %50, %51 : vector<4x256xf32>
    %53 = arith.mulf %52, %42 : vector<4x256xf32>
    %cst_31 = arith.constant 0.254829586 : f32
    %54 = vector.broadcast %cst_31 : f32 to vector<4x256xf32>
    %55 = arith.addf %53, %54 : vector<4x256xf32>
    %56 = arith.mulf %55, %42 : vector<4x256xf32>
    %cst_32 = arith.constant 0.000000e+00 : f32
    %57 = vector.broadcast %cst_32 : f32 to vector<4x256xf32>
    %58 = arith.subf %57, %37 : vector<4x256xf32>
    %59 = arith.mulf %58, %37 : vector<4x256xf32>
    %60 = math.exp %59 : vector<4x256xf32>
    %61 = arith.mulf %56, %60 : vector<4x256xf32>
    %cst_33 = arith.constant 1.000000e+00 : f32
    %62 = vector.broadcast %cst_33 : f32 to vector<4x256xf32>
    %63 = arith.subf %62, %61 : vector<4x256xf32>
    %64 = arith.mulf %36, %63 : vector<4x256xf32>
    %cst_34 = arith.constant 1.000000e+00 : f32
    %65 = vector.broadcast %cst_34 : f32 to vector<4x256xf32>
    %66 = arith.addf %65, %64 : vector<4x256xf32>
    %67 = arith.mulf %29, %66 : vector<4x256xf32>
    %c0_35 = arith.constant 0 : index
    %c0_36 = arith.constant 0 : index
    %c0_37 = arith.constant 0 : index
    %68 = vector.load %arg7[%c0_35, %c0_36, %c0_37] : memref<1x4x256xf32, #tpu.memory_space<vmem>>, vector<1x4x256xf32>
    %69 = vector.shape_cast %68 : vector<1x4x256xf32> to vector<4x256xf32>
    %70 = vector.shape_cast %67 : vector<4x256xf32> to vector<1x4x256xf32>
    tpu.vector_store %arg7[%c0_35, %c0_36, %c0_37], %70 {strides = array<i32>} : memref<1x4x256xf32, #tpu.memory_space<vmem>>, vector<1x4x256xf32>,
    return
  }
  func.func @transform_0(%arg0: i32, %arg1: i32) -> (i32, i32, i32) {
    %c0_i32 = arith.constant 0 : i32
    %c0_i32_0 = arith.constant 0 : i32
    return %arg0, %c0_i32, %arg1 : i32, i32, i32
  }
  func.func @transform_1(%arg0: i32, %arg1: i32) -> (i32, i32, i32, i32) {
    %c0_i32 = arith.constant 0 : i32
    %c0_i32_0 = arith.constant 0 : i32
    %c0_i32_1 = arith.constant 0 : i32
    return %arg0, %arg1, %c0_i32, %c0_i32_0 : i32, i32, i32, i32
  }
  func.func @transform_2(%arg0: i32, %arg1: i32) -> (i32, i32, i32) {
    %c0_i32 = arith.constant 0 : i32
    %c0_i32_0 = arith.constant 0 : i32
    return %arg0, %c0_i32, %arg1 : i32, i32, i32
  }
  func.func @transform_3(%arg0: i32, %arg1: i32) -> (i32, i32, i32) {
    %c0_i32 = arith.constant 0 : i32
    %c0_i32_0 = arith.constant 0 : i32
    %c0_i32_1 = arith.constant 0 : i32
    %c0_i32_2 = arith.constant 0 : i32
    return %c0_i32, %c0_i32_0, %c0_i32_1 : i32, i32, i32
  }
  func.func @transform_4(%arg0: i32, %arg1: i32) -> (i32, i32) {
    %c0_i32 = arith.constant 0 : i32
    %c0_i32_0 = arith.constant 0 : i32
    %c0_i32_1 = arith.constant 0 : i32
    return %c0_i32, %c0_i32_0 : i32, i32
  }
  func.func @transform_5(%arg0: i32, %arg1: i32) -> (i32, i32, i32) {
    %c0_i32 = arith.constant 0 : i32
    %c0_i32_0 = arith.constant 0 : i32
    return %arg0, %c0_i32, %arg1 : i32, i32, i32
  }
}

</mosaic_0001>

<bundles_post_ra>
// kernel: tile.9
= control target key start
LH: loop header
LB: loop body
LE: loop exit
PB: predicated region body
PF: predicated region fallthrough
CT: control target
= control target key end

     0   :  { %s15_s6 = smov 3  ;;  %s18_s7 = smov 12  ;;  %vm20_vm0 = vcmask 1043458   ;;  %vm25_vm1 = vcmask 1045508   ;;  %vm30_vm2 = vcmask 1047558   ;;  %vm4_vm3 = vcmask 1047556   ;;  %s364_s0 = inlined_call_operand.vmem [shape: f32[4,16,16], index: 0, kind: input, shape index: {}]   ;;  %s365_s1 = inlined_call_operand.vmem [shape: f32[4,256], index: 1, kind: output, shape index: {}]  }
   0x1   :  { %v193_v0 = vld [vmem:[%s364_s0 + $0x7] ss:$16 sm:%s15_s6]   ;;  %s23_s12 = smov 48  ;;  %s28_s13 = smov 192  ;;  %vm6_vm4 = vcmask 130048   ;;  %vm34_vm5 = vcmask 1048448  }
   0x2   :  { %v194_v1 = vld [vmem:[%s364_s0 + $0x7] ss:$16 sm:%s18_s7]   ;;  %v195_v3 = vld [vmem:[%s364_s0 - $0x31] ss:$16 sm:%s23_s12]   ;;  %s63_s18 = smov 3  ;;  %s66_s21 = smov 12 }
   0x3   :  { %v21_v2 = vsel %vm20_vm0, %v194_v1, %v193_v0  ;;  %v196_v4 = vld [vmem:[%s364_s0 - $0x31] ss:$16 sm:%s28_s13]   ;;  %v201_v6 = vld [vmem:[%s364_s0 + $0x5] ss:$16 sm:%s63_s18]   ;;  %s71_s22 = smov 48  ;;  %s76_s27 = smov 192 }
   0x4   :  { %v26_v5 = vsel %vm25_vm1, %v195_v3, %v21_v2  ;;  %v202_v8 = vld [vmem:[%s364_s0 + $0x5] ss:$16 sm:%s66_s21]   ;;  %v203_v9 = vld [vmem:[%s364_s0 - $0x33] ss:$16 sm:%s71_s22]   ;;  %s229_s28 = smov 112   ;;  %s39_s2 = smov 3 }
   0x5   :  { %v31_v7 = vsel %vm30_vm2, %v196_v4, %v26_v5  ;;  %v69_v10 = vsel %vm20_vm0, %v202_v8, %v201_v6  ;;  %v204_v11 = vld [vmem:[%s364_s0 - $0x33] ss:$16 sm:%s76_s27]   ;;  %s42_s3 = smov 12  ;;  %v197_v13 = vld [vmem:[%s364_s0 + $0x6] ss:$16 sm:%s39_s2]   ;;  %s47_s8 = smov 48 }
   0x6   :  { %32 = vrot.lane.b32.xlu0 %v31_v7, %s229_s28  ;;  %v74_v12 = vsel %vm25_vm1, %v203_v9, %v69_v10  ;;  %v198_v14 = vld [vmem:[%s364_s0 + $0x6] ss:$16 sm:%s42_s3]   ;;  %s52_s9 = smov 192  ;;  %s87_s14 = smov 3  ;;  %vm58_vm6 = vcmask 917248   ;;  %vm82_vm7 = vcmask 786048  }
   0x7   :  { %v79_v15 = vsel %vm30_vm2, %v204_v11, %v74_v12  ;;  %v45_v16 = vsel %vm20_vm0, %v198_v14, %v197_v13  ;;  %v199_v17 = vld [vmem:[%s364_s0 - $0x32] ss:$16 sm:%s47_s8]   ;;  %s230_s15 = smov 80   ;;  %v205_v20 = vld [vmem:[%s364_s0 + $0x4] ss:$16 sm:%s87_s14]   ;;  %s90_s18 = smov 12 }
   0x8   :  { %v200_v18 = vld [vmem:[%s364_s0 - $0x32] ss:$16 sm:%s52_s9]   ;;  %80 = vrot.lane.b32.xlu1 %v79_v15, %s230_s15  ;;  %v50_v19 = vsel %vm25_vm1, %v199_v17, %v45_v16  ;;  %s95_s19 = smov 48  ;;  %s100_s24 = smov 192  ;;  %vm106_vm8 = vcmask 654848   ;;  %vm130_vm9 = vcmask 523648  }
   0x9   :  { %v55_v21 = vsel %vm30_vm2, %v200_v18, %v50_v19  ;;  %v206_v22 = vld [vmem:[%s364_s0 + $0x4] ss:$16 sm:%s90_s18]   ;;  %v207_v23 = vld [vmem:[%s364_s0 - $0x34] ss:$16 sm:%s95_s19]   ;;  %s231_s25 = smov 96   ;;  %s111_s28 = smov 3 }
   0xa   :  { %56 = vrot.lane.b32.xlu0 %v55_v21, %s231_s25  ;;  %v93_v24 = vsel %vm20_vm0, %v206_v22, %v205_v20  ;;  %v208_v25 = vld [vmem:[%s364_s0 - $0x34] ss:$16 sm:%s100_s24]   ;;  %s114_s29 = smov 12  ;;  %s119_s5 = smov 48  ;;  %vm154_vm10 = vcmask 392448   ;;  %vm178_vm11 = vcmask 261248  }
   0xb   :  { %v98_v26 = vsel %vm25_vm1, %v207_v23, %v93_v24  ;;  %v209_v27 = vld [vmem:[%s364_s0 + $0x3] ss:$16 sm:%s111_s28]   ;;  %s124_s6 = smov 192  ;;  %v211_v31 = vld [vmem:[%s364_s0 - $0x35] ss:$16 sm:%s119_s5]   ;;  %s135_s11 = smov 3 }
   0xc   :  { %v210_v28 = vld [vmem:[%s364_s0 + $0x3] ss:$16 sm:%s114_s29]   ;;  %v103_v29 = vsel %vm30_vm2, %v208_v25, %v98_v26  ;;  %v212_v32 = vld [vmem:[%s364_s0 - $0x35] ss:$16 sm:%s124_s6]   ;;  %s232_s12 = smov 64   ;;  %s138_s15 = smov 12 }
   0xd   :  { %v117_v30 = vsel %vm20_vm0, %v210_v28, %v209_v27  ;;  %104 = vrot.lane.b32.xlu1 %v103_v29, %s232_s12  ;;  %v213_v34 = vld [vmem:[%s364_s0 + $0x2] ss:$16 sm:%s135_s11]   ;;  %s143_s16 = smov 48  ;;  %s148_s21 = smov 192 }
   0xe   :  { %v122_v33 = vsel %vm25_vm1, %v211_v31, %v117_v30  ;;  %v214_v36 = vld [vmem:[%s364_s0 + $0x2] ss:$16 sm:%s138_s15]   ;;  %v215_v37 = vld [vmem:[%s364_s0 - $0x36] ss:$16 sm:%s143_s16]   ;;  %s233_s22 = smov 48   ;;  %s159_s25 = smov 3 }
   0xf   :  { %v127_v35 = vsel %vm30_vm2, %v212_v32, %v122_v33  ;;  %v141_v38 = vsel %vm20_vm0, %v214_v36, %v213_v34  ;;  %v216_v39 = vld [vmem:[%s364_s0 - $0x36] ss:$16 sm:%s148_s21]   ;;  %s162_s26 = smov 12  ;;  %v217_v41 = vld [vmem:[%s364_s0 + $0x1] ss:$16 sm:%s159_s25]   ;;  %s167_s2 = smov 48 }
  0x10   :  { %128 = vrot.lane.b32.xlu0 %v127_v35, %s233_s22  ;;  %v146_v40 = vsel %vm25_vm1, %v215_v37, %v141_v38  ;;  %v218_v42 = vld [vmem:[%s364_s0 + $0x1] ss:$16 sm:%s162_s26]   ;;  %s172_s3 = smov 192  ;;  %s234_s8 = smov 32  }
  0x11   :  { %v151_v43 = vsel %vm30_vm2, %v216_v39, %v146_v40  ;;  %v165_v44 = vsel %vm20_vm0, %v218_v42, %v217_v41  ;;  %v219_v45 = vld [vmem:[%s364_s0 - $0x37] ss:$16 sm:%s167_s2]   ;;  %v2_v48 = vld [vmem:[%s364_s0] ss:$8 sm:$0xf]  }
  0x12   :  { %v220_v46 = vld [vmem:[%s364_s0 - $0x37] ss:$16 sm:%s172_s3]   ;;  %152 = vrot.lane.b32.xlu1 %v151_v43, %s234_s8  ;;  %v170_v47 = vsel %vm25_vm1, %v219_v45, %v165_v44  ;;  %v3_v49 = vld [vmem:[%s364_s0] ss:$8 sm:$0xf0]   ;;  %s235_s0 = smov 16  }
  0x13   :  { %v175_v50 = vsel %vm30_vm2, %v220_v46, %v170_v47  ;;  %v5_v51 = vsel %vm4_vm3, %v3_v49, %v2_v48 }
  0x14   :  { %176 = vrot.lane.b32.xlu0 %v175_v50, %s235_s0  ;;  %7 = vst.msk [vmem:[#allocation0] ss:$8 sm:$0x3] %vm6_vm4, %v5_v51   ;;  %9 = vst.msk [vmem:[#allocation0 - $0xf] ss:$8 sm:$0xc] %vm6_vm4, %v5_v51  }
  0x15   :  { %11 = vst.msk [vmem:[#allocation0 - $0x1e] ss:$8 sm:$0x30] %vm6_vm4, %v5_v51   ;;  %13 = vst.msk [vmem:[#allocation0 - $0x2d] ss:$8 sm:$0xc0] %vm6_vm4, %v5_v51  }
  0x78   :  { %v33_v52 = vpop.permute.xlu0 %32  }
  0x79   :  { %35 = vst.msk [vmem:[#allocation0] sm:$0xf] %vm34_vm5, %v33_v52   ;;  %37 = vst.msk [vmem:[#allocation0 + $0x4] sm:$0xf0] %vm34_vm5, %v33_v52  }
  0x7a   :  { %v81_v53 = vpop.permute.xlu1 %80  }
  0x7c   :  { %v57_v54 = vpop.permute.xlu0 %56  }
  0x7d   :  { %59 = vst.msk [vmem:[#allocation0] sm:$0xf] %vm58_vm6, %v57_v54   ;;  %61 = vst.msk [vmem:[#allocation0 + $0x4] sm:$0xf0] %vm58_vm6, %v57_v54  }
  0x7e   :  { %83 = vst.msk [vmem:[#allocation0] sm:$0xf] %vm82_vm7, %v81_v53   ;;  %85 = vst.msk [vmem:[#allocation0 + $0x4] sm:$0xf0] %vm82_vm7, %v81_v53  }
  0x7f   :  { %v105_v55 = vpop.permute.xlu1 %104  }
  0x80   :  { %107 = vst.msk [vmem:[#allocation0] sm:$0xf] %vm106_vm8, %v105_v55   ;;  %109 = vst.msk [vmem:[#allocation0 + $0x4] sm:$0xf0] %vm106_vm8, %v105_v55  }
  0x82   :  { %v129_v56 = vpop.permute.xlu0 %128  }
  0x83   :  { %131 = vst.msk [vmem:[#allocation0] sm:$0xf] %vm130_vm9, %v129_v56   ;;  %133 = vst.msk [vmem:[#allocation0 + $0x4] sm:$0xf0] %vm130_vm9, %v129_v56  }
  0x84   :  { %v153_v57 = vpop.permute.xlu1 %152  }
  0x85   :  { %155 = vst.msk [vmem:[#allocation0] sm:$0xf] %vm154_vm10, %v153_v57   ;;  %157 = vst.msk [vmem:[#allocation0 + $0x4] sm:$0xf0] %vm154_vm10, %v153_v57  }
  0x86   :  { %v177_v58 = vpop.permute.xlu0 %176  }
  0x87   :  { %179 = vst.msk [vmem:[#allocation0] sm:$0xf] %vm178_vm11, %v177_v58   ;;  %181 = vst.msk [vmem:[#allocation0 + $0x4] sm:$0xf0] %vm178_vm11, %v177_v58  }
  0x8e   :  { %v185_v59 = vld [vmem:[#allocation0] sm:$0xf]  ;;  %v189_v60 = vld [vmem:[#allocation0 + $0x8] sm:$0xf] }
  0x8f   :  { %187 = vst [vmem:[%s365_s1] sm:$0xf] %v185_v59  ;;  %221 = vst [vmem:[%s365_s1 + $0x4] sm:$0xf] %v189_v60 }

// kernel: rfid_st_forward.3
= control target key start
LH: loop header
LB: loop body
LE: loop exit
PB: predicated region body
PF: predicated region fallthrough
CT: control target
= control target key end

     0   :  { %s827_s18 = smov 0   ;;  %s829_s19 = smov 0   ;;  %s896_s0 = inlined_call_operand.vmem [shape: bf16[2,4,256], index: 0, kind: input, shape index: {}]   ;;  %s897_s1 = inlined_call_operand.vmem [shape: bf16[2,1,4,32], index: 1, kind: input, shape index: {}]   ;;  %s898_s2 = inlined_call_operand.vmem [shape: bf16[2,4,256], index: 2, kind: input, shape index: {}]   ;;  %s899_s3 = inlined_call_operand.vmem [shape: bf16[3,4,4], index: 3, kind: input, shape index: {}]   ;;  %s900_s4 = inlined_call_operand.vmem [shape: f32[4,1], index: 4, kind: input, shape index: {}]   ;;  %s901_s5 = inlined_call_operand.vmem [shape: f32[2,4,256], index: 5, kind: output, shape index: {}]  }
   0x1   :  { %s831_s20 = smov 0  }
   0x2 LB: > { %s27_s21 = sadd.s32 1, %s785_s19  ;;  %p710_p0 = scmp.ge.s32.totalorder %s789_s20, 1  ;;  %s789_s20 = sphi %s831_s20, %s15_s20   ;;  %s785_s19 = sphi %s829_s19, %s903_s19   ;;  %s781_s18 = sphi %s827_s18, %s902_s18  }
   0x3   : > { %p29_p1 = scmp.ge.s32.totalorder %s27_s21, 2  ;;  %p239_p2 = scmp.lt.s32.totalorder %s789_s20, 3 }
   0x5   : > { %s905_s21 = smov (%p29_p1, %s27_s21), 0  ;;  %p240_p3 = pnand %p710_p0, %p239_p2 }
   0x6   : > { %p292_p4 = scmp.lt.s32.totalorder (!%p240_p3), %s781_s18, 1  ;;  %s791_s26 = smov (!%p240_p3), 16   ;;  %v792_v2 = vmov (!%p240_p3), 0   ;;  %vm344_vm0 = vcmask (!%p240_p3), 130048   ;;  %vm373_vm1 = vcmask (!%p240_p3), 1041408   ;;  %vm369_vm2 = vcmask (!%p240_p3), 31744  }
   0x7   : > { %243 = sbr.rel (%p240_p3) target bundleno = 531 (0x213), region = 40  ;;  %411 = vmatprep.mubr.bf16.mxu0 (!%p240_p3), %v792_v2  ;;  %479 = vmatprep.mubr.bf16.mxu1 (!%p240_p3), %v792_v2  ;;  %s793_s6 = smov (!%p240_p3), 112   ;;  %v368_v10 = vld [vmem:[%s899_s3] sm:$0x3] (!%p240_p3)  ;;  %vm435_vm3 = vcmask (!%p240_p3), 916480   ;;  %vm501_vm4 = vcmask (!%p240_p3), 785408   ;;  %v362_v28 = vlaneseq (!%p240_p3) }
   0x8   : > { %762 = vset.pattern.permute.xlu0 (!%p240_p3), %v792_v2  ;;  %s794_s7 = smov (!%p240_p3), 96   ;;  %v354_v11 = vld [vmem:[%s900_s4] sm:$0xf] (!%p240_p3)  ;;  %v724_v25 = vld [vmem:[%s899_s3 + $0x4] sm:$0x3] (!%p240_p3) }
   0x9   : > { %v721_v21 = vld [vmem:[%s899_s3 + $0x2] sm:$0x3] (!%p240_p3)  ;;  %v795_v26 = vmov (!%p240_p3), 839922192   ;;  %v363_v30 = vshrl.u32 (!%p240_p3), %v362_v28, 7 }
   0xa   : > { %v360_v27 = vunpack.c.l.s4 (!%p240_p3), %v795_v26 }
   0xc   : > { %v361_v29 = vunpack.c.0.s8 (!%p240_p3), %v360_v27 }
   0xe   : > { %s907_s18 = smov (!%p292_p4, %s781_s18), 1  ;;  %v364_v31 = vsub.s32 %v361_v29, %v363_v30 }
   0xf   : > { %s729_s22 = sshll.u32 %s907_s18, 2  ;;  %s713_s27 = sshll.u32 %s907_s18, 1 }
  0x10   : > { %s299_s25 = scalar_lea.vmem %s896_s0, %s729_s22  ;;  %s307_s30 = scalar_lea.vmem %s897_s1, %s713_s27 }
  0x11   : > { %v718_v0 = vld.sshfl [vmem:[%s299_s25] sm:$0x33 pattern:$0x76325410]  ;;  %s316_s23 = scalar_lea.vmem %s898_s2, %s729_s22  ;;  %s731_s22 = sshll.u32 %s907_s18, 3 }
  0x12   : > { %340 = vrot.lane.b32.xlu0 %v718_v0, %s791_s26  ;;  %v339_v1 = vcombine.high %v718_v0, %v718_v0  ;;  %v330_v3 = vld [vmem:[%s307_s30] sm:$0x3] }
  0x13   : > { %v352_v32 = vld [vmem:[%s316_s23] sm:$0xf] }
  0x14   : > { %v353_v34 = vunpack.c.l.bf16 %v352_v32 }
  0x16   : > { %342 = vrot.lane.b32.xlu0 %v339_v1, %s791_s26  ;;  %s326_s26 = scalar_lea.vmem %s901_s5, %s731_s22 }
  0x84   : > { %v341_v4 = vpop.permute.xlu0 %340 }
  0x85   : > { %v349_v5 = vsel %vm344_vm0, %v330_v3, %v341_v4 }
  0x86   : > { %429 = vrot.lane.b32.xlu1 %v349_v5, %s793_s6  ;;  %v374_v9 = vsel %vm373_vm1, %v349_v5, 0 }
  0x88   : > { %v343_v6 = vpop.permute.xlu0 %342 }
  0x89   : > { %v351_v7 = vsel %vm344_vm0, %v343_v6, %v330_v3  ;;  %v345_v8 = vsel %vm344_vm0, %v341_v4, %v343_v6 }
  0x8a   : > { %495 = vrot.lane.b32.xlu1 %v349_v5, %s794_s7  ;;  %433 = vrot.lane.b32.xlu0 %v351_v7, %s793_s6 }
  0x8b   : > { %719 = vmatprep.subr.msk.bf16.mxu0 %vm373_vm1, %v345_v8 }
  0x8c   : > { %380 = vmatpush1.bf16.msra.mxu0 %v374_v9 }
  0x8e   : > { %497 = vrot.lane.b32.xlu0 %v345_v8, %s794_s7  ;;  %431 = vrot.lane.b32.xlu1 %v345_v8, %s793_s6 }
  0x8f   : > { %720 = vmatmul.mubr.msk.bf16.vlgmr.msra.gmra.mrb[0].mxu0 %vm369_vm2, %v368_v10 }
  0x90   : > { %545 = vmatprep.mubr.bf16.mxu0 %v792_v2 }
  0x92   : > { %499 = vrot.lane.b32.xlu1 %v351_v7, %s794_s7  ;;  %357 = vperm.xlu0 %762, %v354_v11   ;;  %v796_v11 = vmov -1.0  }
  0xf8   : > { %v430_v12 = vpop.permute.xlu1 %429 }
  0xfc   : > { %v496_v13 = vpop.permute.xlu1 %495  ;;  %v434_v14 = vpop.permute.xlu0 %433 }
 0x100   : > { %v498_v15 = vpop.permute.xlu0 %497  ;;  %v432_v16 = vpop.permute.xlu1 %431 }
 0x101   : > { %v437_v17 = vsel %vm435_vm3, %v432_v16, %v434_v14  ;;  %v436_v18 = vsel %vm435_vm3, %v430_v12, %v432_v16  ;;  %v502_v20 = vsel %vm501_vm4, %v496_v13, %v498_v15 }
 0x102   : > { %722 = vmatprep.subr.msk.bf16.mxu1 %vm373_vm1, %v437_v17  ;;  %v442_v19 = vsel %vm373_vm1, %v436_v18, 0  ;;  %v508_v24 = vsel %vm373_vm1, %v502_v20, 0 }
 0x103   : > { %448 = vmatpush1.bf16.msra.mxu1 %v442_v19 }
 0x104   : > { %v500_v22 = vpop.permute.xlu1 %499 }
 0x105   : > { %v503_v23 = vsel %vm501_vm4, %v498_v15, %v500_v22 }
 0x106   : > { %725 = vmatprep.subr.msk.bf16.mxu0 %vm373_vm1, %v503_v23  ;;  %723 = vmatmul.mubr.msk.bf16.vlgmr.msra.gmra.mrb[0].mxu1 %vm369_vm2, %v721_v21 }
 0x107   : > { %514 = vmatpush1.bf16.msra.mxu0 %v508_v24 }
 0x10a   : > { %726 = vmatmul.mubr.msk.bf16.vlgmr.msra.gmra.mrb[4].mxu0 %vm369_vm2, %v724_v25 }
 0x111   : > { %v358_v33 = vpop.permute.xlu0 %357 }
 0x112   : > { %v365_v35 = vrot.slane %v358_v33, %v364_v31 }
 0x114   : > { %v367_v37 = vadd.f32 %v365_v35, %v353_v34 }
 0x162   : > { %v413_v36 = vpop.f32.mrb[0].mxu0 }
 0x163   : > { %v415_v38 = vpop.f32.mrb[1].mxu0 }
 0x164   : > { %v422_v39 = vcombine.low %v413_v36, %v415_v38  ;;  %v417_v40 = vpop.f32.mrb[2].mxu0 }
 0x165   : > { %v418_v41 = vpop.f32.mrb[3].mxu0 }
 0x166   : > { %v424_v42 = vadd.f32 %v422_v39, %v367_v37 }
 0x1d9   : > { %v481_v43 = vpop.f32.mrb[0].mxu1 }
 0x1da   : > { %v483_v44 = vpop.f32.mrb[1].mxu1 }
 0x1db   : > { %v490_v45 = vcombine.low %v481_v43, %v483_v44  ;;  %v485_v46 = vpop.f32.mrb[2].mxu1 }
 0x1dc   : > { %v486_v47 = vpop.f32.mrb[3].mxu1 }
 0x1dd   : > { %v492_v48 = vadd.f32 %v490_v45, %v424_v42  ;;  %v547_v49 = vpop.f32.mrb[4].mxu0 }
 0x1de   : > { %v549_v50 = vpop.f32.mrb[5].mxu0 }
 0x1df   : > { %v556_v51 = vcombine.low %v547_v49, %v549_v50  ;;  %v551_v52 = vpop.f32.mrb[6].mxu0 }
 0x1e0   : > { %v552_v53 = vpop.f32.mrb[7].mxu0 }
 0x1e1   : > { %v558_v54 = vadd.f32 %v556_v51, %v492_v48 }
 0x1e3   : > { %v560_v55 = vmul.f32 0.70710677, %v558_v54  ;;  %v559_v14 = vmul.f32 0.5, %v558_v54 }
 0x1e5   : > { %v563_v56 = vand.u32 2147483647, %v560_v55  ;;  %vm561_vm5 = vcmp.ge.f32.partialorder %v560_v55, 0.0 }
 0x1e6   : > { %v562_v12 = vsel %vm561_vm5, 1.0, %v796_v11 }
 0x1e7   : > { %v564_v57 = vmul.f32 0.3275911, %v563_v56  ;;  %v576_v59 = vsub.f32 0.0, %v563_v56 }
 0x1e9   : > { %v565_v58 = vadd.f32 1.0, %v564_v57  ;;  %v577_v61 = vmul.f32 %v576_v59, %v563_v56 }
 0x1eb   : > { %763 = vrcp.f32 %v565_v58  ;;  %v578_v0 = vmul.f32 1.442695, %v577_v61 }
 0x1ed   : > { %765 = vpow2.f32 %v578_v0 }
 0x1f5   : > { %v764_v60 = vpop.eup %763 }
 0x1f6   : > { %v567_v62 = vmul.f32 1.0614054, %v764_v60 }
 0x1f7   : > { %v766_v8 = vpop.eup %765 }
 0x1f8   : > { %v568_v63 = vadd.f32 -1.4531521, %v567_v62 }
 0x1fa   : > { %v569_v1 = vmul.f32 %v764_v60, %v568_v63 }
 0x1fc   : > { %v570_v2 = vadd.f32 1.4214138, %v569_v1 }
 0x1fe   : > { %v571_v3 = vmul.f32 %v764_v60, %v570_v2 }
 0x200   : > { %v572_v4 = vadd.f32 -0.28449672, %v571_v3 }
 0x202   : > { %v573_v5 = vmul.f32 %v764_v60, %v572_v4 }
 0x204   : > { %v574_v6 = vadd.f32 0.2548296, %v573_v5 }
 0x206   : > { %v575_v7 = vmul.f32 %v764_v60, %v574_v6 }
 0x208   : > { %v580_v9 = vmul.f32 %v766_v8, %v575_v7 }
 0x20a   : > { %v581_v10 = vsub.f32 1.0, %v580_v9 }
 0x20c   : > { %v582_v13 = vmul.f32 %v581_v10, %v562_v12 }
 0x20e   : > { %v583_v15 = vadd.f32 1.0, %v582_v13 }
 0x210   : > { %v584_v16 = vmul.f32 %v583_v15, %v559_v14 }
 0x212   : > { %585 = vst [vmem:[%s326_s26] sm:$0xff] %v584_v16 }
 0x213 PF: > { %s15_s20 = sadd.s32 1, %s789_s20   ;;  %s902_s18 = smov %s785_s19 }
 0x214   : > { %p12_p5 = scmp.ge.s32.totalorder %s15_s20, 4   ;;  %s903_s19 = smov %s905_s21 }
 0x216   :  { %14 = sbr.rel (!%p12_p5) target bundleno = 2 (0x2), region = 78 }

// kernel: rfid_st_forward.2
= control target key start
LH: loop header
LB: loop body
LE: loop exit
PB: predicated region body
PF: predicated region fallthrough
CT: control target
= control target key end

     0   :  { %s1657_s15 = smov 0   ;;  %s1659_s16 = smov 0   ;;  %s2017_s0 = inlined_call_operand.vmem [shape: bf16[2,4,256], index: 0, kind: input, shape index: {}]   ;;  %s2018_s1 = inlined_call_operand.vmem [shape: bf16[12,4], index: 1, kind: input, shape index: {}]   ;;  %s2019_s2 = inlined_call_operand.vmem [shape: bf16[3,256,256], index: 2, kind: input, shape index: {}]   ;;  %s2020_s3 = inlined_call_operand.vmem [shape: f32[4,256], index: 3, kind: input, shape index: {}]   ;;  %s2021_s4 = inlined_call_operand.vmem [shape: bf16[2,4,256], index: 4, kind: output, shape index: {}]  }
   0x1   :  { %s1661_s17 = smov 0  }
   0x2 LB: > { %s26_s18 = sadd.s32 1, %s1624_s16  ;;  %p1252_p0 = scmp.ge.s32.totalorder %s1628_s17, 1  ;;  %s1628_s17 = sphi %s1661_s17, %s14_s17   ;;  %s1624_s16 = sphi %s1659_s16, %s2023_s16   ;;  %s1620_s15 = sphi %s1657_s15, %s2022_s15  }
   0x3   : > { %p28_p1 = scmp.ge.s32.totalorder %s26_s18, 2  ;;  %p183_p2 = scmp.lt.s32.totalorder %s1628_s17, 3 }
   0x5   : > { %s2025_s18 = smov (%p28_p1, %s26_s18), 0  ;;  %p184_p3 = pnand %p1252_p0, %p183_p2 }
   0x6   : > { %p218_p4 = scmp.lt.s32.totalorder (!%p184_p3), %s1620_s15, 1  ;;  %v1630_v0 = vmov (!%p184_p3), 0   ;;  %v1458_v1 = vld [vmem:[%s2019_s2 + $0x4] ss:$8 sps:$4 sm:$0xff] (!%p184_p3)   ;;  %v1460_v2 = vld [vmem:[%s2019_s2] ss:$8 sps:$4 sm:$0xff] (!%p184_p3)  }
   0x7   : > { %187 = sbr.rel (%p184_p3) target bundleno = 741 (0x2e5), region = 36  ;;  %293 = vmatprep.mubr.bf16.mxu0 (!%p184_p3), %v1630_v0  ;;  %v1461_v3 = vld [vmem:[%s2019_s2 + $0x14] ss:$8 sps:$4 sm:$0xff] (!%p184_p3)   ;;  %vm254_vm0 = vcmask (!%p184_p3), 1041408   ;;  %496 = vmatprep.subr.bf16.mxu1 (!%p184_p3), %v1458_v1  ;;  %v1463_v4 = vld [vmem:[%s2019_s2 + $0x10] ss:$8 sps:$4 sm:$0xff] (!%p184_p3)  }
   0x8   : > { %497 = vmatpush1.bf16.msra.mxu1 (!%p184_p3), %v1460_v2  ;;  %v1464_v6 = vld [vmem:[%s2019_s2 + $0x24] ss:$8 sps:$4 sm:$0xff] (!%p184_p3)   ;;  %v240_v9 = vld [vmem:[%s2018_s1] sm:$0x3] (!%p184_p3)  ;;  %vm250_vm1 = vcmask (!%p184_p3), 31744  }
   0x9   : > { %498 = vmatprep.subr.bf16.mxu1 (!%p184_p3), %v1461_v3  ;;  %v1469_v10 = vld [vmem:[%s2019_s2 + $0x20] ss:$8 sps:$4 sm:$0xff] (!%p184_p3)   ;;  %v1468_v11 = vld [vmem:[%s2019_s2 + $0x104] ss:$8 sps:$4 sm:$0xff] (!%p184_p3)   ;;  %v1470_v12 = vld [vmem:[%s2019_s2 + $0x34] ss:$8 sps:$4 sm:$0xff] (!%p184_p3)  }
   0xa   : > { %v1457_v13 = vld [vmem:[%s2018_s1] ss:$0 sps:$4 sm:$0xcc] (!%p184_p3)   ;;  %v1475_v14 = vld [vmem:[%s2019_s2 + $0x30] ss:$8 sps:$4 sm:$0xff] (!%p184_p3)  }
   0xb   : > { %v1476_v15 = vld [vmem:[%s2019_s2 + $0x44] ss:$8 sps:$4 sm:$0xff] (!%p184_p3)   ;;  %v546_v16 = vrot.slane (!%p184_p3), %v1457_v13, 2  ;;  %v1466_v17 = vld [vmem:[%s2019_s2 + $0x100] ss:$8 sps:$4 sm:$0xff] (!%p184_p3)  }
   0xc   : > { %499 = vmatpush1.bf16.msra.mxu1 (!%p184_p3), %v1463_v4  ;;  %v1481_v18 = vld [vmem:[%s2019_s2 + $0x40] ss:$8 sps:$4 sm:$0xff] (!%p184_p3)   ;;  %v1482_v19 = vld [vmem:[%s2019_s2 + $0x54] ss:$8 sps:$4 sm:$0xff] (!%p184_p3)   ;;  %v1472_v21 = vld [vmem:[%s2019_s2 + $0x110] ss:$8 sps:$4 sm:$0xff] (!%p184_p3)  }
   0xd   : > { %500 = vmatprep.subr.bf16.mxu1 (!%p184_p3), %v1464_v6  ;;  %v1474_v20 = vld [vmem:[%s2019_s2 + $0x114] ss:$8 sps:$4 sm:$0xff] (!%p184_p3)   ;;  %v1487_v22 = vld [vmem:[%s2019_s2 + $0x50] ss:$8 sps:$4 sm:$0xff] (!%p184_p3)   ;;  %v1488_v23 = vld [vmem:[%s2019_s2 + $0x64] ss:$8 sps:$4 sm:$0xff] (!%p184_p3)  }
   0xe   : > { %s2027_s15 = smov (!%p218_p4, %s1620_s15), 1  ;;  %v1480_v24 = vld [vmem:[%s2019_s2 + $0x124] ss:$8 sps:$4 sm:$0xff]   ;;  %v1478_v25 = vld [vmem:[%s2019_s2 + $0x120] ss:$8 sps:$4 sm:$0xff]  }
   0xf   : > { %s1429_s25 = sshll.u32 %s2027_s15, 2  ;;  %v1493_v26 = vld [vmem:[%s2019_s2 + $0x60] ss:$8 sps:$4 sm:$0xff]   ;;  %v1494_v27 = vld [vmem:[%s2019_s2 + $0x74] ss:$8 sps:$4 sm:$0xff]  }
  0x10   : > { %s225_s28 = scalar_lea.vmem %s2017_s0, %s1429_s25  ;;  %501 = vmatpush1.bf16.msra.mxu1 %v1469_v10  ;;  %v1486_v28 = vld [vmem:[%s2019_s2 + $0x134] ss:$8 sps:$4 sm:$0xff]   ;;  %v1484_v29 = vld [vmem:[%s2019_s2 + $0x130] ss:$8 sps:$4 sm:$0xff]   ;;  %v1500_v31 = vld [vmem:[%s2019_s2 + $0x84] ss:$8 sps:$4 sm:$0xff]   ;;  %s235_s10 = scalar_lea.vmem %s2021_s4, %s1429_s25 }
  0x11   : > { %v1257_v5 = vld.sshfl [vmem:[%s225_s28] sm:$0x33 pattern:$0x76325410]  ;;  %502 = vmatprep.subr.bf16.mxu1 %v1470_v12  ;;  %v1499_v30 = vld [vmem:[%s2019_s2 + $0x70] ss:$8 sps:$4 sm:$0xff]  }
  0x12   : > { %v1699_v7 = vcombine.high %v1257_v5, %v1257_v5  ;;  %v1702_v8 = vsel %vm254_vm0, %v1257_v5, 0  ;;  %v1492_v32 = vld [vmem:[%s2019_s2 + $0x144] ss:$8 sps:$4 sm:$0xff]   ;;  %v1490_v33 = vld [vmem:[%s2019_s2 + $0x140] ss:$8 sps:$4 sm:$0xff]  }
  0x13   : > { %v1505_v34 = vld [vmem:[%s2019_s2 + $0x80] ss:$8 sps:$4 sm:$0xff]   ;;  %v1506_v35 = vld [vmem:[%s2019_s2 + $0x94] ss:$8 sps:$4 sm:$0xff]   ;;  %v1496_v37 = vld [vmem:[%s2019_s2 + $0x150] ss:$8 sps:$4 sm:$0xff]  }
  0x14   : > { %1258 = vmatprep.subr.msk.bf16.mxu0 %vm254_vm0, %v1699_v7  ;;  %503 = vmatpush1.bf16.msra.mxu1 %v1475_v14  ;;  %v1498_v36 = vld [vmem:[%s2019_s2 + $0x154] ss:$8 sps:$4 sm:$0xff]   ;;  %v1511_v38 = vld [vmem:[%s2019_s2 + $0x90] ss:$8 sps:$4 sm:$0xff]   ;;  %v1512_v39 = vld [vmem:[%s2019_s2 + $0xa4] ss:$8 sps:$4 sm:$0xff]  }
  0x15   : > { %262 = vmatpush1.bf16.msra.mxu0 %v1702_v8  ;;  %504 = vmatprep.subr.bf16.mxu1 %v1476_v15  ;;  %v1504_v40 = vld [vmem:[%s2019_s2 + $0x164] ss:$8 sps:$4 sm:$0xff]   ;;  %v1517_v41 = vld [vmem:[%s2019_s2 + $0xa0] ss:$8 sps:$4 sm:$0xff]   ;;  %v1518_v43 = vld [vmem:[%s2019_s2 + $0xb4] ss:$8 sps:$4 sm:$0xff]  }
  0x16   : > { %1293 = vmatprep.subr.msk.bf16.mxu0 %vm254_vm0, %v1699_v7  ;;  %v1502_v42 = vld [vmem:[%s2019_s2 + $0x160] ss:$8 sps:$4 sm:$0xff]   ;;  %v1510_v44 = vld [vmem:[%s2019_s2 + $0x174] ss:$8 sps:$4 sm:$0xff]   ;;  %v1523_v45 = vld [vmem:[%s2019_s2 + $0xb0] ss:$8 sps:$4 sm:$0xff]  }
  0x17   : > { %v1508_v46 = vld [vmem:[%s2019_s2 + $0x170] ss:$8 sps:$4 sm:$0xff]   ;;  %v1524_v47 = vld [vmem:[%s2019_s2 + $0xc4] ss:$8 sps:$4 sm:$0xff]   ;;  %v1529_v49 = vld [vmem:[%s2019_s2 + $0xc0] ss:$8 sps:$4 sm:$0xff]  }
  0x18   : > { %1259 = vmatmul.mubr.msk.bf16.vlgmr.msra.gmra.mrb[0].mxu0 %vm250_vm1, %v240_v9  ;;  %505 = vmatpush1.bf16.msra.mxu1 %v1481_v18  ;;  %v1516_v48 = vld [vmem:[%s2019_s2 + $0x184] ss:$8 sps:$4 sm:$0xff]   ;;  %v1514_v50 = vld [vmem:[%s2019_s2 + $0x180] ss:$8 sps:$4 sm:$0xff]   ;;  %v1530_v51 = vld [vmem:[%s2019_s2 + $0xd4] ss:$8 sps:$4 sm:$0xff]  }
  0x19   : > { %551 = vmatpush1.bf16.msra.mxu0 %v1702_v8  ;;  %582 = vmatprep.mubr.bf16.mxu0 %v1630_v0  ;;  %v1522_v52 = vld [vmem:[%s2019_s2 + $0x194] ss:$8 sps:$4 sm:$0xff]   ;;  %v1535_v53 = vld [vmem:[%s2019_s2 + $0xd0] ss:$8 sps:$4 sm:$0xff]   ;;  %v1536_v55 = vld [vmem:[%s2019_s2 + $0xe4] ss:$8 sps:$4 sm:$0xff]  }
  0x1a   : > { %786 = vmatprep.subr.bf16.mxu0 %v1468_v11  ;;  %506 = vmatprep.subr.bf16.mxu1 %v1482_v19  ;;  %v1520_v54 = vld [vmem:[%s2019_s2 + $0x190] ss:$8 sps:$4 sm:$0xff]   ;;  %v1528_v56 = vld [vmem:[%s2019_s2 + $0x1a4] ss:$8 sps:$4 sm:$0xff]   ;;  %v1541_v57 = vld [vmem:[%s2019_s2 + $0xe0] ss:$8 sps:$4 sm:$0xff]  }
  0x1b   : > { %v1526_v58 = vld [vmem:[%s2019_s2 + $0x1a0] ss:$8 sps:$4 sm:$0xff]   ;;  %v1534_v59 = vld [vmem:[%s2019_s2 + $0x1b4] ss:$8 sps:$4 sm:$0xff]   ;;  %v1532_v60 = vld [vmem:[%s2019_s2 + $0x1b0] ss:$8 sps:$4 sm:$0xff]  }
  0x1c   : > { %507 = vmatpush1.bf16.msra.mxu1 %v1487_v22  ;;  %v1540_v61 = vld [vmem:[%s2019_s2 + $0x1c4] ss:$8 sps:$4 sm:$0xff]   ;;  %v1538_v62 = vld [vmem:[%s2019_s2 + $0x1c0] ss:$8 sps:$4 sm:$0xff]   ;;  %v1542_v63 = vld [vmem:[%s2019_s2 + $0xf4] ss:$8 sps:$4 sm:$0xff]  }
  0x1d   : > { %508 = vmatprep.subr.bf16.mxu1 %v1488_v23  ;;  %v1546_v1 = vld [vmem:[%s2019_s2 + $0x1d4] ss:$8 sps:$4 sm:$0xff]   ;;  %v1544_v2 = vld [vmem:[%s2019_s2 + $0x1d0] ss:$8 sps:$4 sm:$0xff]   ;;  %v1550_v4 = vld [vmem:[%s2019_s2 + $0x1e4] ss:$8 sps:$4 sm:$0xff]  }
  0x1e   : > { %v1547_v3 = vld [vmem:[%s2019_s2 + $0xf0] ss:$8 sps:$4 sm:$0xff]   ;;  %v1548_v5 = vld [vmem:[%s2019_s2 + $0x1e0] ss:$8 sps:$4 sm:$0xff]   ;;  %v1553_v6 = vld [vmem:[%s2019_s2 + $0x1f4] ss:$8 sps:$4 sm:$0xff]  }
  0x1f   : > { %v1551_v9 = vld [vmem:[%s2019_s2 + $0x1f0] ss:$8 sps:$4 sm:$0xff]   ;;  %v1556_v10 = vld [vmem:[%s2019_s2 + $0x204] ss:$8 sps:$4 sm:$0xff]   ;;  %v1554_v15 = vld [vmem:[%s2019_s2 + $0x200] ss:$8 sps:$4 sm:$0xff]  }
  0x20   : > { %1294 = vmatmul.mubr.msk.bf16.vlgmr.msra.gmra.mrb[4].mxu0 %vm250_vm1, %v546_v16  ;;  %509 = vmatpush1.bf16.msra.mxu1 %v1493_v26  ;;  %v1559_v18 = vld [vmem:[%s2019_s2 + $0x214] ss:$8 sps:$4 sm:$0xff]   ;;  %v1562_v19 = vld [vmem:[%s2019_s2 + $0x224] ss:$8 sps:$4 sm:$0xff]   ;;  %v1560_v26 = vld [vmem:[%s2019_s2 + $0x220] ss:$8 sps:$4 sm:$0xff]  }
  0x21   : > { %787 = vmatpush1.bf16.msra.mxu0 %v1466_v17  ;;  %510 = vmatprep.subr.bf16.mxu1 %v1494_v27  ;;  %v1565_v27 = vld [vmem:[%s2019_s2 + $0x234] ss:$8 sps:$4 sm:$0xff]  }
  0x22   : > { %788 = vmatprep.subr.bf16.mxu0 %v1474_v20 }
  0x24   : > { %511 = vmatpush1.bf16.msra.mxu1 %v1499_v30  ;;  %v832_v30 = vld [vmem:[%s2018_s1 + $0x4] sm:$0x3] }
  0x25   : > { %789 = vmatpush1.bf16.msra.mxu0 %v1472_v21  ;;  %512 = vmatprep.subr.bf16.mxu1 %v1500_v31  ;;  %v1569_v31 = vld [vmem:[%s2019_s2 + $0x250] ss:$8 sps:$4 sm:$0xff]  }
  0x26   : > { %790 = vmatprep.subr.bf16.mxu0 %v1480_v24 }
  0x28   : > { %513 = vmatpush1.bf16.msra.mxu1 %v1505_v34  ;;  %v1577_v34 = vld [vmem:[%s2019_s2 + $0x274] ss:$8 sps:$4 sm:$0xff]  }
  0x29   : > { %791 = vmatpush1.bf16.msra.mxu0 %v1478_v25  ;;  %514 = vmatprep.subr.bf16.mxu1 %v1506_v35  ;;  %v1575_v35 = vld [vmem:[%s2019_s2 + $0x270] ss:$8 sps:$4 sm:$0xff]  }
  0x2a   : > { %792 = vmatprep.subr.bf16.mxu0 %v1486_v28  ;;  %v1563_v28 = vld [vmem:[%s2019_s2 + $0x230] ss:$8 sps:$4 sm:$0xff]  }
  0x2c   : > { %515 = vmatpush1.bf16.msra.mxu1 %v1511_v38  ;;  %v1583_v38 = vld [vmem:[%s2019_s2 + $0x294] ss:$8 sps:$4 sm:$0xff]  }
  0x2d   : > { %793 = vmatpush1.bf16.msra.mxu0 %v1484_v29  ;;  %516 = vmatprep.subr.bf16.mxu1 %v1512_v39  ;;  %v1568_v29 = vld [vmem:[%s2019_s2 + $0x244] ss:$8 sps:$4 sm:$0xff]   ;;  %v1581_v39 = vld [vmem:[%s2019_s2 + $0x290] ss:$8 sps:$4 sm:$0xff]  }
  0x2e   : > { %794 = vmatprep.subr.bf16.mxu0 %v1492_v32  ;;  %v1574_v32 = vld [vmem:[%s2019_s2 + $0x264] ss:$8 sps:$4 sm:$0xff]  }
  0x30   : > { %517 = vmatpush1.bf16.msra.mxu1 %v1517_v41  ;;  %v1584_v41 = vld [vmem:[%s2019_s2 + $0x2a0] ss:$8 sps:$4 sm:$0xff]  }
  0x31   : > { %795 = vmatpush1.bf16.msra.mxu0 %v1490_v33  ;;  %518 = vmatprep.subr.bf16.mxu1 %v1518_v43  ;;  %v1572_v33 = vld [vmem:[%s2019_s2 + $0x260] ss:$8 sps:$4 sm:$0xff]   ;;  %v1587_v43 = vld [vmem:[%s2019_s2 + $0x2b0] ss:$8 sps:$4 sm:$0xff]  }
  0x32   : > { %796 = vmatprep.subr.bf16.mxu0 %v1498_v36  ;;  %v1580_v36 = vld [vmem:[%s2019_s2 + $0x284] ss:$8 sps:$4 sm:$0xff]  }
  0x34   : > { %519 = vmatpush1.bf16.msra.mxu1 %v1523_v45  ;;  %v1590_v45 = vld [vmem:[%s2019_s2 + $0x2c0] ss:$8 sps:$4 sm:$0xff]  }
  0x35   : > { %797 = vmatpush1.bf16.msra.mxu0 %v1496_v37  ;;  %520 = vmatprep.subr.bf16.mxu1 %v1524_v47  ;;  %v1578_v37 = vld [vmem:[%s2019_s2 + $0x280] ss:$8 sps:$4 sm:$0xff]   ;;  %v1593_v47 = vld [vmem:[%s2019_s2 + $0x2d0] ss:$8 sps:$4 sm:$0xff]  }
  0x36   : > { %798 = vmatprep.subr.bf16.mxu0 %v1504_v40  ;;  %v1586_v40 = vld [vmem:[%s2019_s2 + $0x2a4] ss:$8 sps:$4 sm:$0xff]  }
  0x38   : > { %521 = vmatpush1.bf16.msra.mxu1 %v1529_v49  ;;  %v1596_v49 = vld [vmem:[%s2019_s2 + $0x2e0] ss:$8 sps:$4 sm:$0xff]  }
  0x39   : > { %799 = vmatpush1.bf16.msra.mxu0 %v1502_v42  ;;  %522 = vmatprep.subr.bf16.mxu1 %v1530_v51  ;;  %v1589_v42 = vld [vmem:[%s2019_s2 + $0x2b4] ss:$8 sps:$4 sm:$0xff]   ;;  %v1599_v51 = vld [vmem:[%s2019_s2 + $0x2f0] ss:$8 sps:$4 sm:$0xff]  }
  0x3a   : > { %800 = vmatprep.subr.bf16.mxu0 %v1510_v44  ;;  %v1592_v44 = vld [vmem:[%s2019_s2 + $0x2c4] ss:$8 sps:$4 sm:$0xff]  }
  0x3c   : > { %523 = vmatpush1.bf16.msra.mxu1 %v1535_v53 }
  0x3d   : > { %801 = vmatpush1.bf16.msra.mxu0 %v1508_v46  ;;  %524 = vmatprep.subr.bf16.mxu1 %v1536_v55  ;;  %v1595_v46 = vld [vmem:[%s2019_s2 + $0x2d4] ss:$8 sps:$4 sm:$0xff]  }
  0x3e   : > { %802 = vmatprep.subr.bf16.mxu0 %v1516_v48  ;;  %v1598_v48 = vld [vmem:[%s2019_s2 + $0x2e4] ss:$8 sps:$4 sm:$0xff]  }
  0x40   : > { %525 = vmatpush1.bf16.msra.mxu1 %v1541_v57  ;;  %v239_v57 = vld [vmem:[%s2020_s3] sm:$0xff] }
  0x41   : > { %803 = vmatpush1.bf16.msra.mxu0 %v1514_v50  ;;  %526 = vmatprep.subr.bf16.mxu1 %v1542_v63  ;;  %v1601_v50 = vld [vmem:[%s2019_s2 + $0x2f4] ss:$8 sps:$4 sm:$0xff]  }
  0x42   : > { %804 = vmatprep.subr.bf16.mxu0 %v1522_v52 }
  0x44   : > { %527 = vmatpush1.bf16.msra.mxu1 %v1547_v3 }
  0x45   : > { %805 = vmatpush1.bf16.msra.mxu0 %v1520_v54  ;;  %1072 = vmatprep.subr.bf16.mxu1 %v1556_v10 }
  0x46   : > { %806 = vmatprep.subr.bf16.mxu0 %v1528_v56 }
  0x49   : > { %807 = vmatpush1.bf16.msra.mxu0 %v1526_v58 }
  0x4a   : > { %808 = vmatprep.subr.bf16.mxu0 %v1534_v59 }
  0x4d   : > { %809 = vmatpush1.bf16.msra.mxu0 %v1532_v60 }
  0x4e   : > { %810 = vmatprep.subr.bf16.mxu0 %v1540_v61 }
  0x51   : > { %811 = vmatpush1.bf16.msra.mxu0 %v1538_v62 }
  0x52   : > { %812 = vmatprep.subr.bf16.mxu0 %v1546_v1 }
  0x55   : > { %813 = vmatpush1.bf16.msra.mxu0 %v1544_v2 }
  0x56   : > { %814 = vmatprep.subr.bf16.mxu0 %v1550_v4 }
  0x59   : > { %815 = vmatpush1.bf16.msra.mxu0 %v1548_v5 }
  0x5a   : > { %816 = vmatprep.subr.bf16.mxu0 %v1553_v6 }
  0x5d   : > { %817 = vmatpush1.bf16.msra.mxu0 %v1551_v9 }
  0x5e   : > { %1359 = vmatprep.subr.msk.bf16.mxu0 %vm254_vm0, %v1699_v7  ;;  %v1557_v7 = vld [vmem:[%s2019_s2 + $0x210] ss:$8 sps:$4 sm:$0xff]  }
  0xeb   : > { %v295_v11 = vpop.f32.mrb[0].mxu0 }
  0xec   : > { %v297_v12 = vpop.f32.mrb[1].mxu0  ;;  %v302_v16 = vpack.c.bf16 %v295_v11, %v295_v11 }
  0xed   : > { %v299_v13 = vpop.f32.mrb[2].mxu0  ;;  %v303_v14 = vpack.c.bf16 %v297_v12, %v297_v12 }
  0xee   : > { %v300_v17 = vpop.f32.mrb[3].mxu0 }
  0xef   : > { %528 = vmatprep.mubr.bf16.mxu1 %v303_v14 }
  0xf0   : > { %529 = vmatmul.mubr.bf16.vlgmr.msra.gmra.mrb[0].mxu1 %v302_v16 }
  0xf1   : > { %1073 = vmatpush1.bf16.msra.mxu1 %v1554_v15 }
  0xf2   : > { %1074 = vmatprep.subr.bf16.mxu1 %v1559_v18 }
  0xf3   : > { %v584_v20 = vpop.f32.mrb[4].mxu0 }
  0xf4   : > { %v586_v21 = vpop.f32.mrb[5].mxu0  ;;  %v591_v24 = vpack.c.bf16 %v584_v20, %v584_v20 }
  0xf5   : > { %v592_v22 = vpack.c.bf16 %v586_v21, %v586_v21  ;;  %v588_v23 = vpop.f32.mrb[6].mxu0  ;;  %1075 = vmatpush1.bf16.msra.mxu1 %v1557_v7 }
  0xf6   : > { %v589_v25 = vpop.f32.mrb[7].mxu0  ;;  %1076 = vmatprep.subr.bf16.mxu1 %v1562_v19 }
  0xf7   : > { %818 = vmatprep.mubr.bf16.mxu0 %v592_v22 }
  0xf8   : > { %819 = vmatmul.mubr.bf16.vlgmr.msra.gmra.mrb[8].mxu0 %v591_v24 }
  0xf9   : > { %837 = vmatpush1.bf16.msra.mxu0 %v1702_v8  ;;  %868 = vmatprep.mubr.bf16.mxu0 %v1630_v0  ;;  %v1566_v8 = vld [vmem:[%s2019_s2 + $0x240] ss:$8 sps:$4 sm:$0xff]   ;;  %v1571_v0 = vld [vmem:[%s2019_s2 + $0x254] ss:$8 sps:$4 sm:$0xff]  }
  0xfa   : > { %1077 = vmatpush1.bf16.msra.mxu1 %v1560_v26 }
  0xfb   : > { %1078 = vmatprep.subr.bf16.mxu1 %v1565_v27 }
  0xfe   : > { %1079 = vmatpush1.bf16.msra.mxu1 %v1563_v28 }
  0xff   : > { %1080 = vmatprep.subr.bf16.mxu1 %v1568_v29 }
 0x100   : > { %1360 = vmatmul.mubr.msk.bf16.vlgmr.msra.gmra.mrb[12].mxu0 %vm250_vm1, %v832_v30 }
 0x102   : > { %1081 = vmatpush1.bf16.msra.mxu1 %v1566_v8 }
 0x103   : > { %1082 = vmatprep.subr.bf16.mxu1 %v1571_v0 }
 0x106   : > { %1083 = vmatpush1.bf16.msra.mxu1 %v1569_v31 }
 0x107   : > { %1084 = vmatprep.subr.bf16.mxu1 %v1574_v32 }
 0x10a   : > { %1085 = vmatpush1.bf16.msra.mxu1 %v1572_v33  ;;  %v1631_v33 = vmov -1.0  }
 0x10b   : > { %1086 = vmatprep.subr.bf16.mxu1 %v1577_v34 }
 0x10e   : > { %1087 = vmatpush1.bf16.msra.mxu1 %v1575_v35 }
 0x10f   : > { %1088 = vmatprep.subr.bf16.mxu1 %v1580_v36 }
 0x112   : > { %1089 = vmatpush1.bf16.msra.mxu1 %v1578_v37 }
 0x113   : > { %1090 = vmatprep.subr.bf16.mxu1 %v1583_v38 }
 0x116   : > { %1091 = vmatpush1.bf16.msra.mxu1 %v1581_v39 }
 0x117   : > { %1092 = vmatprep.subr.bf16.mxu1 %v1586_v40 }
 0x11a   : > { %1093 = vmatpush1.bf16.msra.mxu1 %v1584_v41 }
 0x11b   : > { %1094 = vmatprep.subr.bf16.mxu1 %v1589_v42 }
 0x11e   : > { %1095 = vmatpush1.bf16.msra.mxu1 %v1587_v43 }
 0x11f   : > { %1096 = vmatprep.subr.bf16.mxu1 %v1592_v44 }
 0x122   : > { %1097 = vmatpush1.bf16.msra.mxu1 %v1590_v45 }
 0x123   : > { %1098 = vmatprep.subr.bf16.mxu1 %v1595_v46 }
 0x126   : > { %1099 = vmatpush1.bf16.msra.mxu1 %v1593_v47 }
 0x127   : > { %1100 = vmatprep.subr.bf16.mxu1 %v1598_v48 }
 0x12a   : > { %1101 = vmatpush1.bf16.msra.mxu1 %v1596_v49 }
 0x12b   : > { %1102 = vmatprep.subr.bf16.mxu1 %v1601_v50 }
 0x12e   : > { %1103 = vmatpush1.bf16.msra.mxu1 %v1599_v51 }
 0x1c3   : > { %v530_v52 = vpop.f32.mrb[0].mxu1 }
 0x1c4   : > { %v532_v53 = vpop.f32.mrb[1].mxu1 }
 0x1c5   : > { %v539_v54 = vcombine.low %v530_v52, %v532_v53  ;;  %v534_v55 = vpop.f32.mrb[2].mxu1 }
 0x1c6   : > { %v535_v56 = vpop.f32.mrb[3].mxu1 }
 0x1c7   : > { %v541_v60 = vadd.f32 %v539_v54, %v239_v57 }
 0x1cb   : > { %v820_v58 = vpop.f32.mrb[8].mxu0 }
 0x1cc   : > { %v822_v59 = vpop.f32.mrb[9].mxu0 }
 0x1cd   : > { %v829_v61 = vcombine.low %v820_v58, %v822_v59  ;;  %v824_v62 = vpop.f32.mrb[10].mxu0 }
 0x1ce   : > { %v825_v63 = vpop.f32.mrb[11].mxu0 }
 0x1cf   : > { %v831_v1 = vadd.f32 %v829_v61, %v541_v60 }
 0x1d3   : > { %v870_v2 = vpop.f32.mrb[12].mxu0 }
 0x1d4   : > { %v872_v3 = vpop.f32.mrb[13].mxu0  ;;  %v877_v6 = vpack.c.bf16 %v870_v2, %v870_v2 }
 0x1d5   : > { %v878_v4 = vpack.c.bf16 %v872_v3, %v872_v3  ;;  %v874_v5 = vpop.f32.mrb[14].mxu0 }
 0x1d6   : > { %v875_v9 = vpop.f32.mrb[15].mxu0 }
 0x1d7   : > { %1104 = vmatprep.mubr.bf16.mxu1 %v878_v4 }
 0x1d8   : > { %1105 = vmatmul.mubr.bf16.vlgmr.msra.gmra.mrb[4].mxu1 %v877_v6 }
 0x2ab   : > { %v1106_v10 = vpop.f32.mrb[4].mxu1 }
 0x2ac   : > { %v1108_v11 = vpop.f32.mrb[5].mxu1 }
 0x2ad   : > { %v1115_v12 = vcombine.low %v1106_v10, %v1108_v11  ;;  %v1110_v13 = vpop.f32.mrb[6].mxu1 }
 0x2ae   : > { %v1111_v14 = vpop.f32.mrb[7].mxu1 }
 0x2af   : > { %v1117_v15 = vadd.f32 %v1115_v12, %v831_v1 }
 0x2b1   : > { %v1119_v16 = vmul.f32 0.70710677, %v1117_v15  ;;  %v1118_v36 = vmul.f32 0.5, %v1117_v15 }
 0x2b3   : > { %v1122_v17 = vand.u32 2147483647, %v1119_v16  ;;  %vm1120_vm2 = vcmp.ge.f32.partialorder %v1119_v16, 0.0 }
 0x2b4   : > { %v1121_v34 = vsel %vm1120_vm2, 1.0, %v1631_v33 }
 0x2b5   : > { %v1123_v18 = vmul.f32 0.3275911, %v1122_v17  ;;  %v1135_v19 = vsub.f32 0.0, %v1122_v17 }
 0x2b7   : > { %v1124_v7 = vadd.f32 1.0, %v1123_v18  ;;  %v1136_v21 = vmul.f32 %v1135_v19, %v1122_v17 }
 0x2b9   : > { %1602 = vrcp.f32 %v1124_v7  ;;  %v1137_v24 = vmul.f32 1.442695, %v1136_v21 }
 0x2bb   : > { %1604 = vpow2.f32 %v1137_v24 }
 0x2c3   : > { %v1603_v20 = vpop.eup %1602 }
 0x2c4   : > { %v1126_v22 = vmul.f32 1.0614054, %v1603_v20 }
 0x2c5   : > { %v1605_v0 = vpop.eup %1604 }
 0x2c6   : > { %v1127_v23 = vadd.f32 -1.4531521, %v1126_v22 }
 0x2c8   : > { %v1128_v25 = vmul.f32 %v1603_v20, %v1127_v23 }
 0x2ca   : > { %v1129_v26 = vadd.f32 1.4214138, %v1128_v25 }
 0x2cc   : > { %v1130_v27 = vmul.f32 %v1603_v20, %v1129_v26 }
 0x2ce   : > { %v1131_v28 = vadd.f32 -0.28449672, %v1130_v27 }
 0x2d0   : > { %v1132_v29 = vmul.f32 %v1603_v20, %v1131_v28 }
 0x2d2   : > { %v1133_v30 = vadd.f32 0.2548296, %v1132_v29 }
 0x2d4   : > { %v1134_v8 = vmul.f32 %v1603_v20, %v1133_v30 }
 0x2d6   : > { %v1139_v31 = vmul.f32 %v1605_v0, %v1134_v8 }
 0x2d8   : > { %v1140_v32 = vsub.f32 1.0, %v1139_v31 }
 0x2da   : > { %v1141_v35 = vmul.f32 %v1140_v32, %v1121_v34 }
 0x2dc   : > { %v1142_v37 = vadd.f32 1.0, %v1141_v35 }
 0x2de   : > { %v1143_v38 = vmul.f32 %v1142_v37, %v1118_v36 }
 0x2e0   : > { %v1145_v39 = vcombine.high %v1143_v38, %v1143_v38 }
 0x2e2   : > { %v1425_v40 = vpack.c.bf16 %v1145_v39, %v1143_v38 }
 0x2e4   : > { %1426 = vst.sshfl [vmem:[%s235_s10] sm:$0x33 pattern:$0x76325410] %v1425_v40 }
 0x2e5 PF: > { %s14_s17 = sadd.s32 1, %s1628_s17   ;;  %s2022_s15 = smov %s1624_s16 }
 0x2e6   : > { %p11_p5 = scmp.ge.s32.totalorder %s14_s17, 4   ;;  %s2023_s16 = smov %s2025_s18 }
 0x2e8   :  { %13 = sbr.rel (!%p11_p5) target bundleno = 2 (0x2), region = 68 }

</bundles_post_ra>
